<compile_context>
chip_gen: v7x
topology: tpu7x:2x2x1
jax: 0.10.0
libtpu: 0.0.40
codegen_flags: <defaults>
</compile_context>

<pallas_src>
import functools

import jax
import jax.numpy as jnp
from jax.experimental import pallas as pl
from jax.experimental.pallas import tpu as pltpu

EPS = 1e-5
# Scoped-VMEM budget: conservative enough for v7x (64 MiB/TC physical); can be
# raised toward ~96 MiB on v5e/v6e (128 MiB) for layers needing bigger blocks.
_VMEM_LIMIT = 48 * 1024 * 1024


def _round_up(x, m):
    return (x + m - 1) // m * m


def _pad_last(a, size):
    pad = size - a.shape[-1]
    if pad == 0:
        return a
    return jnp.pad(a, [(0, 0)] * (a.ndim - 1) + [(0, pad)])


# ---------------------------------------------------------------------------
# Pallas kernels
# ---------------------------------------------------------------------------
def _conv1_shortcut_kernel(p_ref, w1_ref, we_ref,
                           y1_ref, ye_ref, s1_ref, q1_ref, se_ref, qe_ref,
                           *, cin):
    # conv1 (3x3 im2col matmul) + fused 1x1 shortcut + per-image BN partials.
    p = p_ref[0]                                               # (R, Kpad) bf16
    y1 = jnp.dot(p, w1_ref[...], preferred_element_type=jnp.float32)
    pc = p[:, 4 * cin:5 * cin]            # center-tap cols == 1x1 stride-s patches
    ye = jnp.dot(pc, we_ref[...], preferred_element_type=jnp.float32)
    y1_ref[0] = y1.astype(y1_ref.dtype)   # bf16 writeback
    ye_ref[0] = ye.astype(ye_ref.dtype)
    s1_ref[0] = jnp.sum(y1, axis=0, keepdims=True)
    q1_ref[0] = jnp.sum(y1 * y1, axis=0, keepdims=True)
    se_ref[0] = jnp.sum(ye, axis=0, keepdims=True)
    qe_ref[0] = jnp.sum(ye * ye, axis=0, keepdims=True)


def _conv2_stats_kernel(y1p_ref, sc_ref, sh_ref, w2_ref, msrc_ref, mout_ref,
                        y2_ref, s_ref, q_ref, a_scr, *, ho, wo, wq, cpad):
    # Fused BN1(scale/shift)+ReLU on load, then conv2 (3x3, stride 1) as nine
    # shifted matmuls over the flattened padded row raster (row width wq=wo+2).
    # msrc zeroes the spatial halo rows; mout excludes the 2 junk columns per
    # output row from the BN2 statistics.
    a = jnp.maximum(y1p_ref[0].astype(jnp.float32) * sc_ref[...] + sh_ref[...],
                    0.0)
    a_scr[...] = (a * msrc_ref[0]).astype(a_scr.dtype)         # bf16 activations
    lw = ho * wq
    acc = jnp.zeros((lw, cpad), jnp.float32)
    for kh in range(3):
        for kw in range(3):
            lhs = a_scr[pl.ds(kh * wq + kw, lw), :]            # (lw, cpad) bf16
            acc = acc + jnp.dot(lhs, w2_ref[kh * 3 + kw],
                                preferred_element_type=jnp.float32)
    y2_ref[0] = acc.astype(y2_ref.dtype)
    om = mout_ref[0]                                           # (lw, 1)
    s_ref[0] = jnp.sum(acc * om, axis=0, keepdims=True)
    q_ref[0] = jnp.sum(acc * acc * om, axis=0, keepdims=True)


def _bn_add_relu_kernel(y2_ref, s2_ref, b2_ref, ye_ref, se_ref, be_ref, o_ref):
    # Fused: BN2(conv2) + BN_extra(shortcut conv) + residual add + ReLU.
    out2 = y2_ref[0].astype(jnp.float32) * s2_ref[...] + b2_ref[...]
    extra = ye_ref[0].astype(jnp.float32) * se_ref[...] + be_ref[...]
    o_ref[0] = jnp.maximum(out2 + extra, 0.0).astype(o_ref.dtype)


# ---------------------------------------------------------------------------
# pallas_call wrappers (grid over batch images; all axes "parallel")
# ---------------------------------------------------------------------------
def conv1_shortcut_pallas(p1, w1, we, *, cin):
    n, r, kpad = p1.shape
    cpad = w1.shape[1]
    kernel = functools.partial(_conv1_shortcut_kernel, cin=cin)
    return pl.pallas_call(
        kernel,
        grid=(n,),
        in_specs=[
            pl.BlockSpec((1, r, kpad), lambda i: (i, 0, 0)),
            pl.BlockSpec((kpad, cpad), lambda i: (0, 0)),   # weight: fetched once
            pl.BlockSpec((cin, cpad), lambda i: (0, 0)),
        ],
        out_specs=(
            pl.BlockSpec((1, r, cpad), lambda i: (i, 0, 0)),
            pl.BlockSpec((1, r, cpad), lambda i: (i, 0, 0)),
            pl.BlockSpec((1, 1, cpad), lambda i: (i, 0, 0)),
            pl.BlockSpec((1, 1, cpad), lambda i: (i, 0, 0)),
            pl.BlockSpec((1, 1, cpad), lambda i: (i, 0, 0)),
            pl.BlockSpec((1, 1, cpad), lambda i: (i, 0, 0)),
        ),
        out_shape=(
            jax.ShapeDtypeStruct((n, r, cpad), jnp.bfloat16),
            jax.ShapeDtypeStruct((n, r, cpad), jnp.bfloat16),
            jax.ShapeDtypeStruct((n, 1, cpad), jnp.float32),
            jax.ShapeDtypeStruct((n, 1, cpad), jnp.float32),
            jax.ShapeDtypeStruct((n, 1, cpad), jnp.float32),
            jax.ShapeDtypeStruct((n, 1, cpad), jnp.float32),
        ),
        compiler_params=pltpu.CompilerParams(
            dimension_semantics=("parallel",),
            vmem_limit_bytes=_VMEM_LIMIT,
        ),
    )(p1, w1, we)


def conv2_stats_pallas(y1p, sc1, sh1, w2, src_mask, out_mask, *, ho, wo):
    n, rp, cpad = y1p.shape
    wq = wo + 2
    lw = ho * wq
    kernel = functools.partial(_conv2_stats_kernel, ho=ho, wo=wo, wq=wq,
                               cpad=cpad)
    return pl.pallas_call(
        kernel,
        grid=(n,),
        in_specs=[
            pl.BlockSpec((1, rp, cpad), lambda i: (i, 0, 0)),
            pl.BlockSpec((1, cpad), lambda i: (0, 0)),
            pl.BlockSpec((1, cpad), lambda i: (0, 0)),
            pl.BlockSpec((9, cpad, cpad), lambda i: (0, 0, 0)),  # fetched once
            pl.BlockSpec((1, rp, 1), lambda i: (0, 0, 0)),
            pl.BlockSpec((1, lw, 1), lambda i: (0, 0, 0)),
        ],
        out_specs=(
            pl.BlockSpec((1, lw, cpad), lambda i: (i, 0, 0)),
            pl.BlockSpec((1, 1, cpad), lambda i: (i, 0, 0)),
            pl.BlockSpec((1, 1, cpad), lambda i: (i, 0, 0)),
        ),
        out_shape=(
            jax.ShapeDtypeStruct((n, lw, cpad), jnp.bfloat16),
            jax.ShapeDtypeStruct((n, 1, cpad), jnp.float32),
            jax.ShapeDtypeStruct((n, 1, cpad), jnp.float32),
        ),
        scratch_shapes=[pltpu.VMEM((rp, cpad), jnp.bfloat16)],
        compiler_params=pltpu.CompilerParams(
            dimension_semantics=("parallel",),
            vmem_limit_bytes=_VMEM_LIMIT,
        ),
    )(y1p, sc1, sh1, w2, src_mask, out_mask)


def bn_add_relu_pallas(y2, sc2, sh2, ye, sce, she):
    n, r, cpad = y2.shape
    return pl.pallas_call(
        _bn_add_relu_kernel,
        grid=(n,),
        in_specs=[
            pl.BlockSpec((1, r, cpad), lambda i: (i, 0, 0)),
            pl.BlockSpec((1, cpad), lambda i: (0, 0)),
            pl.BlockSpec((1, cpad), lambda i: (0, 0)),
            pl.BlockSpec((1, r, cpad), lambda i: (i, 0, 0)),
            pl.BlockSpec((1, cpad), lambda i: (0, 0)),
            pl.BlockSpec((1, cpad), lambda i: (0, 0)),
        ],
        out_specs=pl.BlockSpec((1, r, cpad), lambda i: (i, 0, 0)),
        out_shape=jax.ShapeDtypeStruct((n, r, cpad), jnp.float32),
        compiler_params=pltpu.CompilerParams(
            dimension_semantics=("parallel",),
            vmem_limit_bytes=_VMEM_LIMIT,
        ),
    )(y2, sc2, sh2, ye, sce, she)


# ---------------------------------------------------------------------------
# Plain-JAX glue: im2col, weight re-layout, BN folding, block wrapper
# ---------------------------------------------------------------------------
def im2col(x_nhwc, ksize, stride, padding):
    # TODO(synk): build the conv1 patches in-kernel from a strided NHWC halo
    # tile to remove the remaining 9x im2col inflation on the input side.
    N, H, W, C = x_nhwc.shape
    xp = jnp.pad(x_nhwc, ((0, 0), (padding, padding), (padding, padding), (0, 0)))
    Ho = (H + 2 * padding - ksize) // stride + 1
    Wo = (W + 2 * padding - ksize) // stride + 1
    cols = []
    for kh in range(ksize):
        for kw in range(ksize):
            cols.append(
                xp[:, kh:kh + stride * Ho:stride, kw:kw + stride * Wo:stride, :])
    return jnp.concatenate(cols, axis=-1), (N, Ho, Wo)   # (N, Ho, Wo, k*k*C)


def w_torch_to_mat(w):
    # PyTorch conv weight (Cout, Cin, KH, KW) -> (KH*KW*Cin, Cout),
    # matching im2col column order [(kh, kw) outer, cin inner].
    Cout, Cin, KH, KW = w.shape
    return jnp.transpose(w, (2, 3, 1, 0)).reshape(KH * KW * Cin, Cout)


def fold_bn(part_sum, part_sq, gamma, beta, m_rows, cpad):
    # Per-image partial stats reduced on the host (pairwise), folded into
    # per-channel scale/shift (biased var, like torch BN in training mode).
    s = jnp.sum(part_sum, axis=0)            # (1, cpad)
    q = jnp.sum(part_sq, axis=0)
    mean = s / float(m_rows)
    var = jnp.maximum(q / float(m_rows) - mean * mean, 0.0)
    scale = _pad_last(gamma, cpad) * jax.lax.rsqrt(var + EPS)
    shift = _pad_last(beta, cpad) - mean * scale
    return scale, shift


def init_params(key, in_channels, out_channels):
    ks = jax.random.split(key, 12)
    n = lambda k, s, sc=0.1: sc * jax.random.normal(k, s, jnp.float32)
    return dict(
        w1=n(ks[0], (out_channels, in_channels, 3, 3)),
        b1=n(ks[1], (1, out_channels)),
        g1=1.0 + n(ks[2], (1, out_channels)),
        be1=n(ks[3], (1, out_channels)),
        w2=n(ks[4], (out_channels, out_channels, 3, 3)),
        b2=n(ks[5], (1, out_channels)),
        g2=1.0 + n(ks[6], (1, out_channels)),
        be2=n(ks[7], (1, out_channels)),
        we=n(ks[8], (out_channels, in_channels, 1, 1)),
        be_b=n(ks[9], (1, out_channels)),
        ge=1.0 + n(ks[10], (1, out_channels)),
        bee=n(ks[11], (1, out_channels)),
    )


def restnet_down_block(x_nchw, p, stride):
    cout, cin = p["w1"].shape[:2]
    cpad = _round_up(cout, 128)   # lane-dense; prefer 256-mult on v6e/v7x for Cout>=256
    # Residual add requires conv2 output shape == conv1 output shape.
    assert stride[1] == 1

    # NCHW -> NHWC, bf16 activations for the MXU and halved im2col HBM traffic.
    x = jnp.transpose(x_nchw, (0, 2, 3, 1)).astype(jnp.bfloat16)

    # conv1 3x3 stride-s patches, K padded to a lane multiple.
    patches, (n, ho, wo) = im2col(x, 3, stride[0], 1)        # (N, Ho, Wo, 9*Cin)
    k1 = 9 * cin
    kpad = _round_up(k1, 128)
    r = ho * wo
    m = n * r
    p1 = _pad_last(patches.reshape(n, r, k1), kpad)          # (N, R, Kpad) bf16

    # Weights -> matmul layout, zero-padded, bf16.  Conv biases are dropped:
    # a per-channel bias before training-mode BN is cancelled by the mean.
    w1 = jnp.pad(w_torch_to_mat(p["w1"]),
                 ((0, kpad - k1), (0, cpad - cout))).astype(jnp.bfloat16)
    we = _pad_last(w_torch_to_mat(p["we"]), cpad).astype(jnp.bfloat16)   # (Cin, Cpad)
    w2 = jnp.transpose(p["w2"], (2, 3, 1, 0)).reshape(9, cout, cout)
    w2 = jnp.pad(w2, ((0, 0), (0, cpad - cout),
                      (0, cpad - cout))).astype(jnp.bfloat16)            # (9, Cpad, Cpad)

    # Pass 1: conv1 + fused 1x1 shortcut + per-image BN partial stats.
    y1, ye, s1, q1, se, qe = conv1_shortcut_pallas(p1, w1, we, cin=cin)
    sc1, sh1 = fold_bn(s1, q1, p["g1"], p["be1"], m, cpad)

    # Pass 2: conv2 fused with BN1+ReLU applied on load.  Host only adds a
    # 1-pixel spatial zero halo around y1 (wide flattened raster, row width
    # wq=Wo+2, +2 slack rows for the last-tap overrun).
    wq = wo + 2
    rp = (ho + 3) * wq
    lw = ho * wq
    y1p = jnp.pad(y1.reshape(n, ho, wo, cpad),
                  ((0, 0), (1, 2), (1, 1), (0, 0))).reshape(n, rp, cpad)
    hm = (jnp.arange(ho + 3) >= 1) & (jnp.arange(ho + 3) <= ho)
    wm = (jnp.arange(wq) >= 1) & (jnp.arange(wq) <= wo)
    src_mask = (hm[:, None] & wm[None, :]).astype(jnp.float32).reshape(1, rp, 1)
    out_mask = jnp.tile(jnp.arange(wq) < wo, ho).astype(jnp.float32).reshape(1, lw, 1)
    y2w, s2, q2 = conv2_stats_pallas(y1p, sc1, sh1, w2, src_mask, out_mask,
                                     ho=ho, wo=wo)

    # Drop the 2 junk columns per row introduced by the wide row raster.
    y2 = y2w.reshape(n, ho, wq, cpad)[:, :, :wo, :].reshape(n, r, cpad)

    sc2, sh2 = fold_bn(s2, q2, p["g2"], p["be2"], m, cpad)
    sce, she = fold_bn(se, qe, p["ge"], p["bee"], m, cpad)

    # Pass 3: BN2 + BN(extra) + residual add + ReLU.
    out = bn_add_relu_pallas(y2, sc2, sh2, ye, sce, she)     # (N, R, Cpad) f32
    out = out[:, :, :cout].reshape(n, ho, wo, cout)
    return jnp.transpose(out, (0, 3, 1, 2))                  # back to NCHW


# ---------------------------------------------------------------------------
# Pure-JAX f32 reference (NCHW) for correctness
# ---------------------------------------------------------------------------
def _ref_conv(x, w, b, stride, padding):
    y = jax.lax.conv_general_dilated(
        x, w, (stride, stride), [(padding, padding)] * 2,
        dimension_numbers=("NCHW", "OIHW", "NCHW"))
    return y + b.reshape(1, -1, 1, 1)


def _ref_bn(y, gamma, beta):
    mean = jnp.mean(y, axis=(0, 2, 3), keepdims=True)
    var = jnp.mean((y - mean) ** 2, axis=(0, 2, 3), keepdims=True)
    return ((y - mean) * jax.lax.rsqrt(var + EPS)
            * gamma.reshape(1, -1, 1, 1) + beta.reshape(1, -1, 1, 1))


def restnet_down_block_ref(x, p, stride):
    extra = _ref_bn(_ref_conv(x, p["we"], p["be_b"], stride[0], 0), p["ge"], p["bee"])
    out = jnp.maximum(_ref_bn(_ref_conv(x, p["w1"], p["b1"], stride[0], 1),
                              p["g1"], p["be1"]), 0.0)
    out = _ref_bn(_ref_conv(out, p["w2"], p["b2"], stride[1], 1), p["g2"], p["be2"])
    return jnp.maximum(extra + out, 0.0)


if __name__ == "__main__":
    key = jax.random.PRNGKey(0)
    k_x, k_p = jax.random.split(key)

    in_channels, out_channels, stride = 4, 8, (2, 1)
    x = jax.random.normal(k_x, (2, in_channels, 16, 16), jnp.float32)  # NCHW
    params = init_params(k_p, in_channels, out_channels)

    fwd = jax.jit(functools.partial(restnet_down_block, stride=stride))
    out = jax.block_until_ready(fwd(x, params))

    ref = restnet_down_block_ref(x, params, stride)
    assert out.shape == ref.shape == (2, out_channels, 8, 8)
    # bf16 MXU operands + bf16 y1/ye/y2 intermediates -> loosened tolerance.
    err = float(jnp.max(jnp.abs(out - ref)))
    assert jnp.allclose(out, ref, atol=5e-2, rtol=5e-2), f"max_abs_err={err}"
    print("KERNEL_OK")
</pallas_src>

<mosaic_0001>
module attributes {stable_mosaic.version = 11 : i64} {
  func.func @_conv1_shortcut_kernel(%arg0: i32, %arg1: memref<1x64x128xbf16, #tpu.memory_space<vmem>>, %arg2: memref<128x128xbf16, #tpu.memory_space<vmem>>, %arg3: memref<4x128xbf16, #tpu.memory_space<vmem>>, %arg4: memref<1x64x128xbf16, #tpu.memory_space<vmem>>, %arg5: memref<1x64x128xbf16, #tpu.memory_space<vmem>>, %arg6: memref<1x1x128xf32, #tpu.memory_space<vmem>>, %arg7: memref<1x1x128xf32, #tpu.memory_space<vmem>>, %arg8: memref<1x1x128xf32, #tpu.memory_space<vmem>>, %arg9: memref<1x1x128xf32, #tpu.memory_space<vmem>>) attributes {dimension_semantics = [#tpu.dimension_semantics<parallel>], iteration_bounds = array<i64: 2>, scalar_prefetch = 0 : i64, scratch_operands = 0 : i64, tpu.core_type = #tpu.core_type<tc>, window_params = [{transform_indices = @transform_0, window_bounds = array<i64: 1, 64, 128>}, {pipeline_mode = #tpu.pipeline_mode<synchronous>, transform_indices = @transform_1, window_bounds = array<i64: 128, 128>}, {pipeline_mode = #tpu.pipeline_mode<synchronous>, transform_indices = @transform_2, window_bounds = array<i64: 4, 128>}, {transform_indices = @transform_3, window_bounds = array<i64: 1, 64, 128>}, {transform_indices = @transform_4, window_bounds = array<i64: 1, 64, 128>}, {transform_indices = @transform_5, window_bounds = array<i64: 1, 1, 128>}, {transform_indices = @transform_6, window_bounds = array<i64: 1, 1, 128>}, {transform_indices = @transform_7, window_bounds = array<i64: 1, 1, 128>}, {transform_indices = @transform_8, window_bounds = array<i64: 1, 1, 128>}]} {
    %c0 = arith.constant 0 : index
    %c0_0 = arith.constant 0 : index
    %c0_1 = arith.constant 0 : index
    %0 = vector.load %arg1[%c0, %c0_0, %c0_1] : memref<1x64x128xbf16, #tpu.memory_space<vmem>>, vector<1x64x128xbf16>
    %1 = vector.shape_cast %0 : vector<1x64x128xbf16> to vector<64x128xbf16>
    %c0_2 = arith.constant 0 : index
    %c0_3 = arith.constant 0 : index
    %2 = vector.load %arg2[%c0_2, %c0_3] : memref<128x128xbf16, #tpu.memory_space<vmem>>, vector<128x128xbf16>
    %cst = arith.constant dense<0.000000e+00> : vector<64x128xf32>
    %3 = tpu.matmul %1, %2, %cst {dimension_numbers = #tpu.dot_dimension_numbers<[1], [0], [0], [1], [0, 0, 1, 1], [], []>} : vector<64x128xbf16>, vector<128x128xbf16>, vector<64x128xf32> -> vector<64x128xf32>
    %4 = vector.extract_strided_slice %1 {offsets = [0, 16], sizes = [64, 4], strides = [1, 1]} : vector<64x128xbf16> to vector<64x4xbf16>
    %c0_4 = arith.constant 0 : index
    %c0_5 = arith.constant 0 : index
    %5 = vector.load %arg3[%c0_4, %c0_5] : memref<4x128xbf16, #tpu.memory_space<vmem>>, vector<4x128xbf16>
    %cst_6 = arith.constant dense<0.000000e+00> : vector<64x128xf32>
    %6 = tpu.matmul %4, %5, %cst_6 {dimension_numbers = #tpu.dot_dimension_numbers<[1], [0], [0], [1], [0, 0, 1, 1], [], []>} : vector<64x4xbf16>, vector<4x128xbf16>, vector<64x128xf32> -> vector<64x128xf32>
    %7 = arith.truncf %3 : vector<64x128xf32> to vector<64x128xbf16>
    %c0_7 = arith.constant 0 : index
    %c0_8 = arith.constant 0 : index
    %c0_9 = arith.constant 0 : index
    %8 = vector.load %arg4[%c0_7, %c0_8, %c0_9] : memref<1x64x128xbf16, #tpu.memory_space<vmem>>, vector<1x64x128xbf16>
    %9 = vector.shape_cast %8 : vector<1x64x128xbf16> to vector<64x128xbf16>
    %10 = vector.shape_cast %7 : vector<64x128xbf16> to vector<1x64x128xbf16>
    tpu.vector_store %arg4[%c0_7, %c0_8, %c0_9], %10 {strides = array<i32>} : memref<1x64x128xbf16, #tpu.memory_space<vmem>>, vector<1x64x128xbf16>,
    %11 = arith.truncf %6 : vector<64x128xf32> to vector<64x128xbf16>
    %c0_10 = arith.constant 0 : index
    %c0_11 = arith.constant 0 : index
    %c0_12 = arith.constant 0 : index
    %12 = vector.load %arg5[%c0_10, %c0_11, %c0_12] : memref<1x64x128xbf16, #tpu.memory_space<vmem>>, vector<1x64x128xbf16>
    %13 = vector.shape_cast %12 : vector<1x64x128xbf16> to vector<64x128xbf16>
    %14 = vector.shape_cast %11 : vector<64x128xbf16> to vector<1x64x128xbf16>
    tpu.vector_store %arg5[%c0_10, %c0_11, %c0_12], %14 {strides = array<i32>} : memref<1x64x128xbf16, #tpu.memory_space<vmem>>, vector<1x64x128xbf16>,
    %cst_13 = arith.constant dense<0.000000e+00> : vector<128xf32>
    %15 = vector.multi_reduction <add>, %3, %cst_13 [0] : vector<64x128xf32> to vector<128xf32>
    %16 = vector.shape_cast %15 : vector<128xf32> to vector<1x128xf32>
    %c0_14 = arith.constant 0 : index
    %c0_15 = arith.constant 0 : index
    %c0_16 = arith.constant 0 : index
    %17 = vector.load %arg6[%c0_14, %c0_15, %c0_16] : memref<1x1x128xf32, #tpu.memory_space<vmem>>, vector<1x1x128xf32>
    %18 = vector.shape_cast %17 : vector<1x1x128xf32> to vector<1x128xf32>
    %19 = vector.shape_cast %16 : vector<1x128xf32> to vector<1x1x128xf32>
    tpu.vector_store %arg6[%c0_14, %c0_15, %c0_16], %19 {strides = array<i32>} : memref<1x1x128xf32, #tpu.memory_space<vmem>>, vector<1x1x128xf32>,
    %20 = arith.mulf %3, %3 : vector<64x128xf32>
    %cst_17 = arith.constant dense<0.000000e+00> : vector<128xf32>
    %21 = vector.multi_reduction <add>, %20, %cst_17 [0] : vector<64x128xf32> to vector<128xf32>
    %22 = vector.shape_cast %21 : vector<128xf32> to vector<1x128xf32>
    %c0_18 = arith.constant 0 : index
    %c0_19 = arith.constant 0 : index
    %c0_20 = arith.constant 0 : index
    %23 = vector.load %arg7[%c0_18, %c0_19, %c0_20] : memref<1x1x128xf32, #tpu.memory_space<vmem>>, vector<1x1x128xf32>
    %24 = vector.shape_cast %23 : vector<1x1x128xf32> to vector<1x128xf32>
    %25 = vector.shape_cast %22 : vector<1x128xf32> to vector<1x1x128xf32>
    tpu.vector_store %arg7[%c0_18, %c0_19, %c0_20], %25 {strides = array<i32>} : memref<1x1x128xf32, #tpu.memory_space<vmem>>, vector<1x1x128xf32>,
    %cst_21 = arith.constant dense<0.000000e+00> : vector<128xf32>
    %26 = vector.multi_reduction <add>, %6, %cst_21 [0] : vector<64x128xf32> to vector<128xf32>
    %27 = vector.shape_cast %26 : vector<128xf32> to vector<1x128xf32>
    %c0_22 = arith.constant 0 : index
    %c0_23 = arith.constant 0 : index
    %c0_24 = arith.constant 0 : index
    %28 = vector.load %arg8[%c0_22, %c0_23, %c0_24] : memref<1x1x128xf32, #tpu.memory_space<vmem>>, vector<1x1x128xf32>
    %29 = vector.shape_cast %28 : vector<1x1x128xf32> to vector<1x128xf32>
    %30 = vector.shape_cast %27 : vector<1x128xf32> to vector<1x1x128xf32>
    tpu.vector_store %arg8[%c0_22, %c0_23, %c0_24], %30 {strides = array<i32>} : memref<1x1x128xf32, #tpu.memory_space<vmem>>, vector<1x1x128xf32>,
    %31 = arith.mulf %6, %6 : vector<64x128xf32>
    %cst_25 = arith.constant dense<0.000000e+00> : vector<128xf32>
    %32 = vector.multi_reduction <add>, %31, %cst_25 [0] : vector<64x128xf32> to vector<128xf32>
    %33 = vector.shape_cast %32 : vector<128xf32> to vector<1x128xf32>
    %c0_26 = arith.constant 0 : index
    %c0_27 = arith.constant 0 : index
    %c0_28 = arith.constant 0 : index
    %34 = vector.load %arg9[%c0_26, %c0_27, %c0_28] : memref<1x1x128xf32, #tpu.memory_space<vmem>>, vector<1x1x128xf32>
    %35 = vector.shape_cast %34 : vector<1x1x128xf32> to vector<1x128xf32>
    %36 = vector.shape_cast %33 : vector<1x128xf32> to vector<1x1x128xf32>
    tpu.vector_store %arg9[%c0_26, %c0_27, %c0_28], %36 {strides = array<i32>} : memref<1x1x128xf32, #tpu.memory_space<vmem>>, vector<1x1x128xf32>,
    return
  }
  func.func @transform_0(%arg0: i32) -> (i32, i32, i32) {
    %c0_i32 = arith.constant 0 : i32
    %c0_i32_0 = arith.constant 0 : i32
    %c0_i32_1 = arith.constant 0 : i32
    return %arg0, %c0_i32, %c0_i32_0 : i32, i32, i32
  }
  func.func @transform_1(%arg0: i32) -> (i32, i32) {
    %c0_i32 = arith.constant 0 : i32
    %c0_i32_0 = arith.constant 0 : i32
    %c0_i32_1 = arith.constant 0 : i32
    return %c0_i32, %c0_i32_0 : i32, i32
  }
  func.func @transform_2(%arg0: i32) -> (i32, i32) {
    %c0_i32 = arith.constant 0 : i32
    %c0_i32_0 = arith.constant 0 : i32
    %c0_i32_1 = arith.constant 0 : i32
    return %c0_i32, %c0_i32_0 : i32, i32
  }
  func.func @transform_3(%arg0: i32) -> (i32, i32, i32) {
    %c0_i32 = arith.constant 0 : i32
    %c0_i32_0 = arith.constant 0 : i32
    %c0_i32_1 = arith.constant 0 : i32
    return %arg0, %c0_i32, %c0_i32_0 : i32, i32, i32
  }
  func.func @transform_4(%arg0: i32) -> (i32, i32, i32) {
    %c0_i32 = arith.constant 0 : i32
    %c0_i32_0 = arith.constant 0 : i32
    %c0_i32_1 = arith.constant 0 : i32
    return %arg0, %c0_i32, %c0_i32_0 : i32, i32, i32
  }
  func.func @transform_5(%arg0: i32) -> (i32, i32, i32) {
    %c0_i32 = arith.constant 0 : i32
    %c0_i32_0 = arith.constant 0 : i32
    %c0_i32_1 = arith.constant 0 : i32
    return %arg0, %c0_i32, %c0_i32_0 : i32, i32, i32
  }
  func.func @transform_6(%arg0: i32) -> (i32, i32, i32) {
    %c0_i32 = arith.constant 0 : i32
    %c0_i32_0 = arith.constant 0 : i32
    %c0_i32_1 = arith.constant 0 : i32
    return %arg0, %c0_i32, %c0_i32_0 : i32, i32, i32
  }
  func.func @transform_7(%arg0: i32) -> (i32, i32, i32) {
    %c0_i32 = arith.constant 0 : i32
    %c0_i32_0 = arith.constant 0 : i32
    %c0_i32_1 = arith.constant 0 : i32
    return %arg0, %c0_i32, %c0_i32_0 : i32, i32, i32
  }
  func.func @transform_8(%arg0: i32) -> (i32, i32, i32) {
    %c0_i32 = arith.constant 0 : i32
    %c0_i32_0 = arith.constant 0 : i32
    %c0_i32_1 = arith.constant 0 : i32
    return %arg0, %c0_i32, %c0_i32_0 : i32, i32, i32
  }
}

module attributes {stable_mosaic.version = 11 : i64} {
  func.func @_conv2_stats_kernel(%arg0: i32, %arg1: memref<1x110x128xbf16, #tpu.memory_space<vmem>>, %arg2: memref<1x128xf32, #tpu.memory_space<vmem>>, %arg3: memref<1x128xf32, #tpu.memory_space<vmem>>, %arg4: memref<9x128x128xbf16, #tpu.memory_space<vmem>>, %arg5: memref<1x110x1xf32, #tpu.memory_space<vmem>>, %arg6: memref<1x80x1xf32, #tpu.memory_space<vmem>>, %arg7: memref<1x80x128xbf16, #tpu.memory_space<vmem>>, %arg8: memref<1x1x128xf32, #tpu.memory_space<vmem>>, %arg9: memref<1x1x128xf32, #tpu.memory_space<vmem>>, %arg10: memref<110x128xbf16, #tpu.memory_space<vmem>>) attributes {dimension_semantics = [#tpu.dimension_semantics<parallel>], iteration_bounds = array<i64: 2>, scalar_prefetch = 0 : i64, scratch_operands = 1 : i64, tpu.core_type = #tpu.core_type<tc>, window_params = [{transform_indices = @transform_0, window_bounds = array<i64: 1, 110, 128>}, {pipeline_mode = #tpu.pipeline_mode<synchronous>, transform_indices = @transform_1, window_bounds = array<i64: 1, 128>}, {pipeline_mode = #tpu.pipeline_mode<synchronous>, transform_indices = @transform_2, window_bounds = array<i64: 1, 128>}, {pipeline_mode = #tpu.pipeline_mode<synchronous>, transform_indices = @transform_3, window_bounds = array<i64: 9, 128, 128>}, {pipeline_mode = #tpu.pipeline_mode<synchronous>, transform_indices = @transform_4, window_bounds = array<i64: 1, 110, 1>}, {pipeline_mode = #tpu.pipeline_mode<synchronous>, transform_indices = @transform_5, window_bounds = array<i64: 1, 80, 1>}, {transform_indices = @transform_6, window_bounds = array<i64: 1, 80, 128>}, {transform_indices = @transform_7, window_bounds = array<i64: 1, 1, 128>}, {transform_indices = @transform_8, window_bounds = array<i64: 1, 1, 128>}]} {
    %c0 = arith.constant 0 : index
    %c0_0 = arith.constant 0 : index
    %c0_1 = arith.constant 0 : index
    %0 = vector.load %arg1[%c0, %c0_0, %c0_1] : memref<1x110x128xbf16, #tpu.memory_space<vmem>>, vector<1x110x128xbf16>
    %1 = vector.shape_cast %0 : vector<1x110x128xbf16> to vector<110x128xbf16>
    %2 = arith.extf %1 : vector<110x128xbf16> to vector<110x128xf32>
    %c0_2 = arith.constant 0 : index
    %c0_3 = arith.constant 0 : index
    %3 = vector.load %arg2[%c0_2, %c0_3] : memref<1x128xf32, #tpu.memory_space<vmem>>, vector<1x128xf32>
    %4 = vector.broadcast %3 : vector<1x128xf32> to vector<110x128xf32>
    %5 = arith.mulf %2, %4 : vector<110x128xf32>
    %c0_4 = arith.constant 0 : index
    %c0_5 = arith.constant 0 : index
    %6 = vector.load %arg3[%c0_4, %c0_5] : memref<1x128xf32, #tpu.memory_space<vmem>>, vector<1x128xf32>
    %7 = vector.broadcast %6 : vector<1x128xf32> to vector<110x128xf32>
    %8 = arith.addf %5, %7 : vector<110x128xf32>
    %cst = arith.constant 0.000000e+00 : f32
    %9 = vector.broadcast %cst : f32 to vector<110x128xf32>
    %10 = arith.maximumf %8, %9 : vector<110x128xf32>
    %c0_6 = arith.constant 0 : index
    %c0_7 = arith.constant 0 : index
    %c0_8 = arith.constant 0 : index
    %11 = vector.load %arg5[%c0_6, %c0_7, %c0_8] : memref<1x110x1xf32, #tpu.memory_space<vmem>>, vector<1x110x1xf32>
    %12 = vector.shape_cast %11 : vector<1x110x1xf32> to vector<110x1xf32>
    %13 = vector.broadcast %12 : vector<110x1xf32> to vector<110x128xf32>
    %14 = arith.mulf %10, %13 : vector<110x128xf32>
    %15 = arith.truncf %14 : vector<110x128xf32> to vector<110x128xbf16>
    %c0_9 = arith.constant 0 : index
    %c0_10 = arith.constant 0 : index
    %16 = vector.load %arg10[%c0_9, %c0_10] : memref<110x128xbf16, #tpu.memory_space<vmem>>, vector<110x128xbf16>
    tpu.vector_store %arg10[%c0_9, %c0_10], %15 {strides = array<i32>} : memref<110x128xbf16, #tpu.memory_space<vmem>>, vector<110x128xbf16>,
    %cst_11 = arith.constant 0.000000e+00 : f32
    %17 = vector.broadcast %cst_11 : f32 to vector<80x128xf32>
    %c0_12 = arith.constant 0 : index
    %c0_13 = arith.constant 0 : index
    %18 = vector.load %arg10[%c0_12, %c0_13] : memref<110x128xbf16, #tpu.memory_space<vmem>>, vector<80x128xbf16>
    %c0_14 = arith.constant 0 : index
    %c0_15 = arith.constant 0 : index
    %c0_16 = arith.constant 0 : index
    %19 = vector.load %arg4[%c0_14, %c0_15, %c0_16] : memref<9x128x128xbf16, #tpu.memory_space<vmem>>, vector<1x128x128xbf16>
    %20 = vector.shape_cast %19 : vector<1x128x128xbf16> to vector<128x128xbf16>
    %cst_17 = arith.constant dense<0.000000e+00> : vector<80x128xf32>
    %21 = tpu.matmul %18, %20, %cst_17 {dimension_numbers = #tpu.dot_dimension_numbers<[1], [0], [0], [1], [0, 0, 1, 1], [], []>} : vector<80x128xbf16>, vector<128x128xbf16>, vector<80x128xf32> -> vector<80x128xf32>
    %22 = arith.addf %17, %21 : vector<80x128xf32>
    %c1 = arith.constant 1 : index
    %c0_18 = arith.constant 0 : index
    %23 = vector.load %arg10[%c1, %c0_18] : memref<110x128xbf16, #tpu.memory_space<vmem>>, vector<80x128xbf16>
    %c1_19 = arith.constant 1 : index
    %c0_20 = arith.constant 0 : index
    %c0_21 = arith.constant 0 : index
    %24 = vector.load %arg4[%c1_19, %c0_20, %c0_21] : memref<9x128x128xbf16, #tpu.memory_space<vmem>>, vector<1x128x128xbf16>
    %25 = vector.shape_cast %24 : vector<1x128x128xbf16> to vector<128x128xbf16>
    %cst_22 = arith.constant dense<0.000000e+00> : vector<80x128xf32>
    %26 = tpu.matmul %23, %25, %cst_22 {dimension_numbers = #tpu.dot_dimension_numbers<[1], [0], [0], [1], [0, 0, 1, 1], [], []>} : vector<80x128xbf16>, vector<128x128xbf16>, vector<80x128xf32> -> vector<80x128xf32>
    %27 = arith.addf %22, %26 : vector<80x128xf32>
    %c2 = arith.constant 2 : index
    %c0_23 = arith.constant 0 : index
    %28 = vector.load %arg10[%c2, %c0_23] : memref<110x128xbf16, #tpu.memory_space<vmem>>, vector<80x128xbf16>
    %c2_24 = arith.constant 2 : index
    %c0_25 = arith.constant 0 : index
    %c0_26 = arith.constant 0 : index
    %29 = vector.load %arg4[%c2_24, %c0_25, %c0_26] : memref<9x128x128xbf16, #tpu.memory_space<vmem>>, vector<1x128x128xbf16>
    %30 = vector.shape_cast %29 : vector<1x128x128xbf16> to vector<128x128xbf16>
    %cst_27 = arith.constant dense<0.000000e+00> : vector<80x128xf32>
    %31 = tpu.matmul %28, %30, %cst_27 {dimension_numbers = #tpu.dot_dimension_numbers<[1], [0], [0], [1], [0, 0, 1, 1], [], []>} : vector<80x128xbf16>, vector<128x128xbf16>, vector<80x128xf32> -> vector<80x128xf32>
    %32 = arith.addf %27, %31 : vector<80x128xf32>
    %c10 = arith.constant 10 : index
    %c0_28 = arith.constant 0 : index
    %33 = vector.load %arg10[%c10, %c0_28] : memref<110x128xbf16, #tpu.memory_space<vmem>>, vector<80x128xbf16>
    %c3 = arith.constant 3 : index
    %c0_29 = arith.constant 0 : index
    %c0_30 = arith.constant 0 : index
    %34 = vector.load %arg4[%c3, %c0_29, %c0_30] : memref<9x128x128xbf16, #tpu.memory_space<vmem>>, vector<1x128x128xbf16>
    %35 = vector.shape_cast %34 : vector<1x128x128xbf16> to vector<128x128xbf16>
    %cst_31 = arith.constant dense<0.000000e+00> : vector<80x128xf32>
    %36 = tpu.matmul %33, %35, %cst_31 {dimension_numbers = #tpu.dot_dimension_numbers<[1], [0], [0], [1], [0, 0, 1, 1], [], []>} : vector<80x128xbf16>, vector<128x128xbf16>, vector<80x128xf32> -> vector<80x128xf32>
    %37 = arith.addf %32, %36 : vector<80x128xf32>
    %c11 = arith.constant 11 : index
    %c0_32 = arith.constant 0 : index
    %38 = vector.load %arg10[%c11, %c0_32] : memref<110x128xbf16, #tpu.memory_space<vmem>>, vector<80x128xbf16>
    %c4 = arith.constant 4 : index
    %c0_33 = arith.constant 0 : index
    %c0_34 = arith.constant 0 : index
    %39 = vector.load %arg4[%c4, %c0_33, %c0_34] : memref<9x128x128xbf16, #tpu.memory_space<vmem>>, vector<1x128x128xbf16>
    %40 = vector.shape_cast %39 : vector<1x128x128xbf16> to vector<128x128xbf16>
    %cst_35 = arith.constant dense<0.000000e+00> : vector<80x128xf32>
    %41 = tpu.matmul %38, %40, %cst_35 {dimension_numbers = #tpu.dot_dimension_numbers<[1], [0], [0], [1], [0, 0, 1, 1], [], []>} : vector<80x128xbf16>, vector<128x128xbf16>, vector<80x128xf32> -> vector<80x128xf32>
    %42 = arith.addf %37, %41 : vector<80x128xf32>
    %c12 = arith.constant 12 : index
    %c0_36 = arith.constant 0 : index
    %43 = vector.load %arg10[%c12, %c0_36] : memref<110x128xbf16, #tpu.memory_space<vmem>>, vector<80x128xbf16>
    %c5 = arith.constant 5 : index
    %c0_37 = arith.constant 0 : index
    %c0_38 = arith.constant 0 : index
    %44 = vector.load %arg4[%c5, %c0_37, %c0_38] : memref<9x128x128xbf16, #tpu.memory_space<vmem>>, vector<1x128x128xbf16>
    %45 = vector.shape_cast %44 : vector<1x128x128xbf16> to vector<128x128xbf16>
    %cst_39 = arith.constant dense<0.000000e+00> : vector<80x128xf32>
    %46 = tpu.matmul %43, %45, %cst_39 {dimension_numbers = #tpu.dot_dimension_numbers<[1], [0], [0], [1], [0, 0, 1, 1], [], []>} : vector<80x128xbf16>, vector<128x128xbf16>, vector<80x128xf32> -> vector<80x128xf32>
    %47 = arith.addf %42, %46 : vector<80x128xf32>
    %c20 = arith.constant 20 : index
    %c0_40 = arith.constant 0 : index
    %48 = vector.load %arg10[%c20, %c0_40] : memref<110x128xbf16, #tpu.memory_space<vmem>>, vector<80x128xbf16>
    %c6 = arith.constant 6 : index
    %c0_41 = arith.constant 0 : index
    %c0_42 = arith.constant 0 : index
    %49 = vector.load %arg4[%c6, %c0_41, %c0_42] : memref<9x128x128xbf16, #tpu.memory_space<vmem>>, vector<1x128x128xbf16>
    %50 = vector.shape_cast %49 : vector<1x128x128xbf16> to vector<128x128xbf16>
    %cst_43 = arith.constant dense<0.000000e+00> : vector<80x128xf32>
    %51 = tpu.matmul %48, %50, %cst_43 {dimension_numbers = #tpu.dot_dimension_numbers<[1], [0], [0], [1], [0, 0, 1, 1], [], []>} : vector<80x128xbf16>, vector<128x128xbf16>, vector<80x128xf32> -> vector<80x128xf32>
    %52 = arith.addf %47, %51 : vector<80x128xf32>
    %c21 = arith.constant 21 : index
    %c0_44 = arith.constant 0 : index
    %53 = vector.load %arg10[%c21, %c0_44] : memref<110x128xbf16, #tpu.memory_space<vmem>>, vector<80x128xbf16>
    %c7 = arith.constant 7 : index
    %c0_45 = arith.constant 0 : index
    %c0_46 = arith.constant 0 : index
    %54 = vector.load %arg4[%c7, %c0_45, %c0_46] : memref<9x128x128xbf16, #tpu.memory_space<vmem>>, vector<1x128x128xbf16>
    %55 = vector.shape_cast %54 : vector<1x128x128xbf16> to vector<128x128xbf16>
    %cst_47 = arith.constant dense<0.000000e+00> : vector<80x128xf32>
    %56 = tpu.matmul %53, %55, %cst_47 {dimension_numbers = #tpu.dot_dimension_numbers<[1], [0], [0], [1], [0, 0, 1, 1], [], []>} : vector<80x128xbf16>, vector<128x128xbf16>, vector<80x128xf32> -> vector<80x128xf32>
    %57 = arith.addf %52, %56 : vector<80x128xf32>
    %c22 = arith.constant 22 : index
    %c0_48 = arith.constant 0 : index
    %58 = vector.load %arg10[%c22, %c0_48] : memref<110x128xbf16, #tpu.memory_space<vmem>>, vector<80x128xbf16>
    %c8 = arith.constant 8 : index
    %c0_49 = arith.constant 0 : index
    %c0_50 = arith.constant 0 : index
    %59 = vector.load %arg4[%c8, %c0_49, %c0_50] : memref<9x128x128xbf16, #tpu.memory_space<vmem>>, vector<1x128x128xbf16>
    %60 = vector.shape_cast %59 : vector<1x128x128xbf16> to vector<128x128xbf16>
    %cst_51 = arith.constant dense<0.000000e+00> : vector<80x128xf32>
    %61 = tpu.matmul %58, %60, %cst_51 {dimension_numbers = #tpu.dot_dimension_numbers<[1], [0], [0], [1], [0, 0, 1, 1], [], []>} : vector<80x128xbf16>, vector<128x128xbf16>, vector<80x128xf32> -> vector<80x128xf32>
    %62 = arith.addf %57, %61 : vector<80x128xf32>
    %63 = arith.truncf %62 : vector<80x128xf32> to vector<80x128xbf16>
    %c0_52 = arith.constant 0 : index
    %c0_53 = arith.constant 0 : index
    %c0_54 = arith.constant 0 : index
    %64 = vector.load %arg7[%c0_52, %c0_53, %c0_54] : memref<1x80x128xbf16, #tpu.memory_space<vmem>>, vector<1x80x128xbf16>
    %65 = vector.shape_cast %64 : vector<1x80x128xbf16> to vector<80x128xbf16>
    %66 = vector.shape_cast %63 : vector<80x128xbf16> to vector<1x80x128xbf16>
    tpu.vector_store %arg7[%c0_52, %c0_53, %c0_54], %66 {strides = array<i32>} : memref<1x80x128xbf16, #tpu.memory_space<vmem>>, vector<1x80x128xbf16>,
    %c0_55 = arith.constant 0 : index
    %c0_56 = arith.constant 0 : index
    %c0_57 = arith.constant 0 : index
    %67 = vector.load %arg6[%c0_55, %c0_56, %c0_57] : memref<1x80x1xf32, #tpu.memory_space<vmem>>, vector<1x80x1xf32>
    %68 = vector.shape_cast %67 : vector<1x80x1xf32> to vector<80x1xf32>
    %69 = vector.broadcast %68 : vector<80x1xf32> to vector<80x128xf32>
    %70 = arith.mulf %62, %69 : vector<80x128xf32>
    %cst_58 = arith.constant dense<0.000000e+00> : vector<128xf32>
    %71 = vector.multi_reduction <add>, %70, %cst_58 [0] : vector<80x128xf32> to vector<128xf32>
    %72 = vector.shape_cast %71 : vector<128xf32> to vector<1x128xf32>
    %c0_59 = arith.constant 0 : index
    %c0_60 = arith.constant 0 : index
    %c0_61 = arith.constant 0 : index
    %73 = vector.load %arg8[%c0_59, %c0_60, %c0_61] : memref<1x1x128xf32, #tpu.memory_space<vmem>>, vector<1x1x128xf32>
    %74 = vector.shape_cast %73 : vector<1x1x128xf32> to vector<1x128xf32>
    %75 = vector.shape_cast %72 : vector<1x128xf32> to vector<1x1x128xf32>
    tpu.vector_store %arg8[%c0_59, %c0_60, %c0_61], %75 {strides = array<i32>} : memref<1x1x128xf32, #tpu.memory_space<vmem>>, vector<1x1x128xf32>,
    %76 = arith.mulf %62, %62 : vector<80x128xf32>
    %77 = vector.broadcast %68 : vector<80x1xf32> to vector<80x128xf32>
    %78 = arith.mulf %76, %77 : vector<80x128xf32>
    %cst_62 = arith.constant dense<0.000000e+00> : vector<128xf32>
    %79 = vector.multi_reduction <add>, %78, %cst_62 [0] : vector<80x128xf32> to vector<128xf32>
    %80 = vector.shape_cast %79 : vector<128xf32> to vector<1x128xf32>
    %c0_63 = arith.constant 0 : index
    %c0_64 = arith.constant 0 : index
    %c0_65 = arith.constant 0 : index
    %81 = vector.load %arg9[%c0_63, %c0_64, %c0_65] : memref<1x1x128xf32, #tpu.memory_space<vmem>>, vector<1x1x128xf32>
    %82 = vector.shape_cast %81 : vector<1x1x128xf32> to vector<1x128xf32>
    %83 = vector.shape_cast %80 : vector<1x128xf32> to vector<1x1x128xf32>
    tpu.vector_store %arg9[%c0_63, %c0_64, %c0_65], %83 {strides = array<i32>} : memref<1x1x128xf32, #tpu.memory_space<vmem>>, vector<1x1x128xf32>,
    return
  }
  func.func @transform_0(%arg0: i32) -> (i32, i32, i32) {
    %c0_i32 = arith.constant 0 : i32
    %c0_i32_0 = arith.constant 0 : i32
    %c0_i32_1 = arith.constant 0 : i32
    return %arg0, %c0_i32, %c0_i32_0 : i32, i32, i32
  }
  func.func @transform_1(%arg0: i32) -> (i32, i32) {
    %c0_i32 = arith.constant 0 : i32
    %c0_i32_0 = arith.constant 0 : i32
    %c0_i32_1 = arith.constant 0 : i32
    return %c0_i32, %c0_i32_0 : i32, i32
  }
  func.func @transform_2(%arg0: i32) -> (i32, i32) {
    %c0_i32 = arith.constant 0 : i32
    %c0_i32_0 = arith.constant 0 : i32
    %c0_i32_1 = arith.constant 0 : i32
    return %c0_i32, %c0_i32_0 : i32, i32
  }
  func.func @transform_3(%arg0: i32) -> (i32, i32, i32) {
    %c0_i32 = arith.constant 0 : i32
    %c0_i32_0 = arith.constant 0 : i32
    %c0_i32_1 = arith.constant 0 : i32
    %c0_i32_2 = arith.constant 0 : i32
    return %c0_i32, %c0_i32_0, %c0_i32_1 : i32, i32, i32
  }
  func.func @transform_4(%arg0: i32) -> (i32, i32, i32) {
    %c0_i32 = arith.constant 0 : i32
    %c0_i32_0 = arith.constant 0 : i32
    %c0_i32_1 = arith.constant 0 : i32
    %c0_i32_2 = arith.constant 0 : i32
    return %c0_i32, %c0_i32_0, %c0_i32_1 : i32, i32, i32
  }
  func.func @transform_5(%arg0: i32) -> (i32, i32, i32) {
    %c0_i32 = arith.constant 0 : i32
    %c0_i32_0 = arith.constant 0 : i32
    %c0_i32_1 = arith.constant 0 : i32
    %c0_i32_2 = arith.constant 0 : i32
    return %c0_i32, %c0_i32_0, %c0_i32_1 : i32, i32, i32
  }
  func.func @transform_6(%arg0: i32) -> (i32, i32, i32) {
    %c0_i32 = arith.constant 0 : i32
    %c0_i32_0 = arith.constant 0 : i32
    %c0_i32_1 = arith.constant 0 : i32
    return %arg0, %c0_i32, %c0_i32_0 : i32, i32, i32
  }
  func.func @transform_7(%arg0: i32) -> (i32, i32, i32) {
    %c0_i32 = arith.constant 0 : i32
    %c0_i32_0 = arith.constant 0 : i32
    %c0_i32_1 = arith.constant 0 : i32
    return %arg0, %c0_i32, %c0_i32_0 : i32, i32, i32
  }
  func.func @transform_8(%arg0: i32) -> (i32, i32, i32) {
    %c0_i32 = arith.constant 0 : i32
    %c0_i32_0 = arith.constant 0 : i32
    %c0_i32_1 = arith.constant 0 : i32
    return %arg0, %c0_i32, %c0_i32_0 : i32, i32, i32
  }
}

module attributes {stable_mosaic.version = 11 : i64} {
  func.func @_bn_add_relu_kernel(%arg0: i32, %arg1: memref<1x64x128xbf16, #tpu.memory_space<vmem>>, %arg2: memref<1x128xf32, #tpu.memory_space<vmem>>, %arg3: memref<1x128xf32, #tpu.memory_space<vmem>>, %arg4: memref<1x64x128xbf16, #tpu.memory_space<vmem>>, %arg5: memref<1x128xf32, #tpu.memory_space<vmem>>, %arg6: memref<1x128xf32, #tpu.memory_space<vmem>>, %arg7: memref<1x64x128xf32, #tpu.memory_space<vmem>>) attributes {dimension_semantics = [#tpu.dimension_semantics<parallel>], iteration_bounds = array<i64: 2>, scalar_prefetch = 0 : i64, scratch_operands = 0 : i64, tpu.core_type = #tpu.core_type<tc>, window_params = [{transform_indices = @transform_0, window_bounds = array<i64: 1, 64, 128>}, {pipeline_mode = #tpu.pipeline_mode<synchronous>, transform_indices = @transform_1, window_bounds = array<i64: 1, 128>}, {pipeline_mode = #tpu.pipeline_mode<synchronous>, transform_indices = @transform_2, window_bounds = array<i64: 1, 128>}, {transform_indices = @transform_3, window_bounds = array<i64: 1, 64, 128>}, {pipeline_mode = #tpu.pipeline_mode<synchronous>, transform_indices = @transform_4, window_bounds = array<i64: 1, 128>}, {pipeline_mode = #tpu.pipeline_mode<synchronous>, transform_indices = @transform_5, window_bounds = array<i64: 1, 128>}, {transform_indices = @transform_6, window_bounds = array<i64: 1, 64, 128>}]} {
    %c0 = arith.constant 0 : index
    %c0_0 = arith.constant 0 : index
    %c0_1 = arith.constant 0 : index
    %0 = vector.load %arg1[%c0, %c0_0, %c0_1] : memref<1x64x128xbf16, #tpu.memory_space<vmem>>, vector<1x64x128xbf16>
    %1 = vector.shape_cast %0 : vector<1x64x128xbf16> to vector<64x128xbf16>
    %2 = arith.extf %1 : vector<64x128xbf16> to vector<64x128xf32>
    %c0_2 = arith.constant 0 : index
    %c0_3 = arith.constant 0 : index
    %3 = vector.load %arg2[%c0_2, %c0_3] : memref<1x128xf32, #tpu.memory_space<vmem>>, vector<1x128xf32>
    %4 = vector.broadcast %3 : vector<1x128xf32> to vector<64x128xf32>
    %5 = arith.mulf %2, %4 : vector<64x128xf32>
    %c0_4 = arith.constant 0 : index
    %c0_5 = arith.constant 0 : index
    %6 = vector.load %arg3[%c0_4, %c0_5] : memref<1x128xf32, #tpu.memory_space<vmem>>, vector<1x128xf32>
    %7 = vector.broadcast %6 : vector<1x128xf32> to vector<64x128xf32>
    %8 = arith.addf %5, %7 : vector<64x128xf32>
    %c0_6 = arith.constant 0 : index
    %c0_7 = arith.constant 0 : index
    %c0_8 = arith.constant 0 : index
    %9 = vector.load %arg4[%c0_6, %c0_7, %c0_8] : memref<1x64x128xbf16, #tpu.memory_space<vmem>>, vector<1x64x128xbf16>
    %10 = vector.shape_cast %9 : vector<1x64x128xbf16> to vector<64x128xbf16>
    %11 = arith.extf %10 : vector<64x128xbf16> to vector<64x128xf32>
    %c0_9 = arith.constant 0 : index
    %c0_10 = arith.constant 0 : index
    %12 = vector.load %arg5[%c0_9, %c0_10] : memref<1x128xf32, #tpu.memory_space<vmem>>, vector<1x128xf32>
    %13 = vector.broadcast %12 : vector<1x128xf32> to vector<64x128xf32>
    %14 = arith.mulf %11, %13 : vector<64x128xf32>
    %c0_11 = arith.constant 0 : index
    %c0_12 = arith.constant 0 : index
    %15 = vector.load %arg6[%c0_11, %c0_12] : memref<1x128xf32, #tpu.memory_space<vmem>>, vector<1x128xf32>
    %16 = vector.broadcast %15 : vector<1x128xf32> to vector<64x128xf32>
    %17 = arith.addf %14, %16 : vector<64x128xf32>
    %18 = arith.addf %8, %17 : vector<64x128xf32>
    %cst = arith.constant 0.000000e+00 : f32
    %19 = vector.broadcast %cst : f32 to vector<64x128xf32>
    %20 = arith.maximumf %18, %19 : vector<64x128xf32>
    %c0_13 = arith.constant 0 : index
    %c0_14 = arith.constant 0 : index
    %c0_15 = arith.constant 0 : index
    %21 = vector.load %arg7[%c0_13, %c0_14, %c0_15] : memref<1x64x128xf32, #tpu.memory_space<vmem>>, vector<1x64x128xf32>
    %22 = vector.shape_cast %21 : vector<1x64x128xf32> to vector<64x128xf32>
    %23 = vector.shape_cast %20 : vector<64x128xf32> to vector<1x64x128xf32>
    tpu.vector_store %arg7[%c0_13, %c0_14, %c0_15], %23 {strides = array<i32>} : memref<1x64x128xf32, #tpu.memory_space<vmem>>, vector<1x64x128xf32>,
    return
  }
  func.func @transform_0(%arg0: i32) -> (i32, i32, i32) {
    %c0_i32 = arith.constant 0 : i32
    %c0_i32_0 = arith.constant 0 : i32
    %c0_i32_1 = arith.constant 0 : i32
    return %arg0, %c0_i32, %c0_i32_0 : i32, i32, i32
  }
  func.func @transform_1(%arg0: i32) -> (i32, i32) {
    %c0_i32 = arith.constant 0 : i32
    %c0_i32_0 = arith.constant 0 : i32
    %c0_i32_1 = arith.constant 0 : i32
    return %c0_i32, %c0_i32_0 : i32, i32
  }
  func.func @transform_2(%arg0: i32) -> (i32, i32) {
    %c0_i32 = arith.constant 0 : i32
    %c0_i32_0 = arith.constant 0 : i32
    %c0_i32_1 = arith.constant 0 : i32
    return %c0_i32, %c0_i32_0 : i32, i32
  }
  func.func @transform_3(%arg0: i32) -> (i32, i32, i32) {
    %c0_i32 = arith.constant 0 : i32
    %c0_i32_0 = arith.constant 0 : i32
    %c0_i32_1 = arith.constant 0 : i32
    return %arg0, %c0_i32, %c0_i32_0 : i32, i32, i32
  }
  func.func @transform_4(%arg0: i32) -> (i32, i32) {
    %c0_i32 = arith.constant 0 : i32
    %c0_i32_0 = arith.constant 0 : i32
    %c0_i32_1 = arith.constant 0 : i32
    return %c0_i32, %c0_i32_0 : i32, i32
  }
  func.func @transform_5(%arg0: i32) -> (i32, i32) {
    %c0_i32 = arith.constant 0 : i32
    %c0_i32_0 = arith.constant 0 : i32
    %c0_i32_1 = arith.constant 0 : i32
    return %c0_i32, %c0_i32_0 : i32, i32
  }
  func.func @transform_6(%arg0: i32) -> (i32, i32, i32) {
    %c0_i32 = arith.constant 0 : i32
    %c0_i32_0 = arith.constant 0 : i32
    %c0_i32_1 = arith.constant 0 : i32
    return %arg0, %c0_i32, %c0_i32_0 : i32, i32, i32
  }
}

</mosaic_0001>

<bundles_post_ra>
// kernel: restnet_down_block.3
= control target key start
LH: loop header
LB: loop body
LE: loop exit
PB: predicated region body
PF: predicated region fallthrough
CT: control target
= control target key end

     0   :  { %s1181_s27 = smov 0   ;;  %s1252_s0 = inlined_call_operand.vmem [shape: bf16[2,64,128], index: 0, kind: input, shape index: {}]   ;;  %s1253_s1 = inlined_call_operand.vmem [shape: bf16[128,128], index: 1, kind: input, shape index: {}]   ;;  %s1254_s2 = inlined_call_operand.vmem [shape: bf16[4,128], index: 2, kind: input, shape index: {}]   ;;  %s1255_s3 = inlined_call_operand.vmem [shape: bf16[2,64,128], index: 3, kind: output, shape index: {0}]   ;;  %s1256_s4 = inlined_call_operand.vmem [shape: bf16[2,64,128], index: 4, kind: output, shape index: {1}]   ;;  %s1257_s5 = inlined_call_operand.vmem [shape: f32[2,1,128], index: 5, kind: output, shape index: {2}]   ;;  %s1258_s6 = inlined_call_operand.vmem [shape: f32[2,1,128], index: 6, kind: output, shape index: {3}]   ;;  %s1259_s7 = inlined_call_operand.vmem [shape: f32[2,1,128], index: 7, kind: output, shape index: {4}]   ;;  %s1260_s8 = inlined_call_operand.vmem [shape: f32[2,1,128], index: 8, kind: output, shape index: {5}]  }
   0x1 LB: > { %s944_s28 = sadd.s32 4294967295, %s1133_s27   ;;  %p948_p0 = scmp.ge.s32.totalorder %s1133_s27, 1  ;;  %s1133_s27 = sphi %s1181_s27, %s19_s27  }
   0x2   : > { %p273_p1 = scmp.lt.s32.totalorder %s1133_s27, 3 }
   0x4   : > { %p274_p2 = pnand %p948_p0, %p273_p1 }
   0x5   : > { %p324_p3 = scmp.lt.s32.totalorder (!%p274_p2), %s944_s28, 1  ;;  %v1119_v0 = vld [vmem:[%s1253_s1] sm:$0xff] (!%p274_p2)   ;;  %v1120_v1 = vld [vmem:[%s1253_s1 + $0x8] sm:$0xff] (!%p274_p2)   ;;  %v1121_v2 = vld [vmem:[%s1253_s1 + $0x10] sm:$0xff] (!%p274_p2)   ;;  %s1135_s17 = smov (!%p274_p2), 112   ;;  %vm535_vm0 = vcmask (!%p274_p2), 1041408  }
   0x6   : > { %277 = sbr.rel (%p274_p2) target bundleno = 380 (0x17c), region = 32  ;;  %1071 = vmatprep.subr.bf16.mxu0 (!%p274_p2), %v1119_v0  ;;  %v1122_v6 = vld [vmem:[%s1253_s1 + $0x18] sm:$0xff] (!%p274_p2)   ;;  %v513_v8 = vld [vmem:[%s1254_s2] sm:$0x3] (!%p274_p2)  ;;  %v1124_v11 = vld [vmem:[%s1253_s1 + $0x28] sm:$0xff] (!%p274_p2)   ;;  %vm522_vm1 = vcmask (!%p274_p2), 31744  }
   0x7   : > { %1072 = vmatpush3.bf16.msra.mxu0 (!%p274_p2), %v1119_v0  ;;  %v1123_v9 = vld [vmem:[%s1253_s1 + $0x20] sm:$0xff] (!%p274_p2)   ;;  %1105 = vmatprep.subr.msk.bf16.mxu1 (!%p274_p2), %vm535_vm0, %v513_v8  ;;  %v537_v10 = vsel (!%p274_p2), %vm535_vm0, %v513_v8, 0  ;;  %v1125_v12 = vld [vmem:[%s1253_s1 + $0x30] sm:$0xff] (!%p274_p2)   ;;  %v1126_v13 = vld [vmem:[%s1253_s1 + $0x38] sm:$0xff] (!%p274_p2)  }
   0x8   : > { %1073 = vmatprep.subr.bf16.mxu0 (!%p274_p2), %v1120_v1  ;;  %1096 = vmatpush3.bf16.msra.mxu1 (!%p274_p2), %v537_v10 }
   0xb   : > { %1074 = vmatpush3.bf16.msra.mxu0 (!%p274_p2), %v1120_v1 }
   0xc   : > { %1075 = vmatprep.subr.bf16.mxu0 (!%p274_p2), %v1121_v2 }
   0xd   : > { %s1262_s28 = smov (!%p324_p3, %s944_s28), 1 }
   0xe   : > { %s1198_s11 = sshll.u32 %s1262_s28, 5  ;;  %s341_s16 = scalar_lea.vmem %s1257_s5, %s1262_s28 }
   0xf   : > { %s328_s14 = scalar_lea.vmem %s1252_s0, %s1198_s11  ;;  %1076 = vmatpush3.bf16.msra.mxu0 %v1121_v2  ;;  %s333_s13 = scalar_lea.vmem %s1255_s3, %s1198_s11 }
  0x10   : > { %v1115_v3 = vld [vmem:[%s328_s14] sm:$0xff]   ;;  %v1116_v4 = vld [vmem:[%s328_s14 + $0x8] sm:$0xff]   ;;  %v1117_v5 = vld [vmem:[%s328_s14 + $0x10] sm:$0xff]   ;;  %1077 = vmatprep.subr.bf16.mxu0 %v1122_v6  ;;  %s344_s19 = scalar_lea.vmem %s1258_s6, %s1262_s28  ;;  %s338_s22 = scalar_lea.vmem %s1256_s4, %s1198_s11 }
  0x11   : > { %514 = vrot.lane.b32.xlu0 %v1115_v3, %s1135_s17  ;;  %1087 = vmatprep.mubr.bf16.mxu0 %v1115_v3  ;;  %v1118_v7 = vld [vmem:[%s328_s14 + $0x18] sm:$0xff]   ;;  %s347_s24 = scalar_lea.vmem %s1259_s7, %s1262_s28  ;;  %s350_s29 = scalar_lea.vmem %s1260_s8, %s1262_s28 }
  0x12   : > { %518 = vrot.lane.b32.xlu1 %v1117_v5, %s1135_s17 }
  0x13   : > { %1078 = vmatpush3.bf16.msra.mxu0 %v1122_v6 }
  0x14   : > { %1079 = vmatprep.subr.bf16.mxu0 %v1123_v9 }
  0x15   : > { %516 = vrot.lane.b32.xlu0 %v1116_v4, %s1135_s17 }
  0x16   : > { %520 = vrot.lane.b32.xlu1 %v1118_v7, %s1135_s17 }
  0x17   : > { %1080 = vmatpush3.bf16.msra.mxu0 %v1123_v9 }
  0x18   : > { %1081 = vmatprep.subr.bf16.mxu0 %v1124_v11 }
  0x1b   : > { %1082 = vmatpush3.bf16.msra.mxu0 %v1124_v11 }
  0x1c   : > { %1083 = vmatprep.subr.bf16.mxu0 %v1125_v12 }
  0x1f   : > { %1084 = vmatpush3.bf16.msra.mxu0 %v1125_v12 }
  0x20   : > { %1085 = vmatprep.subr.bf16.mxu0 %v1126_v13 }
  0x23   : > { %1086 = vmatpush3.bf16.msra.mxu0 %v1126_v13 }
  0x26   : > { %1088 = vmatmul.mubr.bf16.vlgmr.msra.gmra.mrb[0].mxu0 %v1116_v4 }
  0x27   : > { %1091 = vmatprep.mubr.bf16.mxu0 %v1117_v5 }
  0x2e   : > { %1092 = vmatmul.mubr.bf16.gmra.mrb[4].mxu0 %v1118_v7 }
  0x83   : > { %v515_v14 = vpop.permute.xlu0 %514 }
  0x84   : > { %1097 = vmatprep.mubr.msk.bf16.mxu1 %vm522_vm1, %v515_v14  ;;  %v519_v15 = vpop.permute.xlu1 %518 }
  0x87   : > { %v517_v16 = vpop.permute.xlu0 %516 }
  0x88   : > { %1098 = vmatmul.mubr.msk.bf16.vlgmr.msra.gmra.mrb[0].mxu1 %vm522_vm1, %v517_v16  ;;  %v521_v17 = vpop.permute.xlu1 %520 }
  0x89   : > { %1101 = vmatprep.mubr.msk.bf16.mxu1 %vm522_vm1, %v519_v15 }
  0x90   : > { %1102 = vmatmul.mubr.msk.bf16.gmra.mrb[4].mxu1 %vm522_vm1, %v521_v17 }
  0xf9   : > { %v1089_v18 = vpop.f32.mrb[0].mxu0 }
  0xfa   : > { %v482_v19 = vpop.f32.mrb[1].mxu0  ;;  %v700_v24 = vmul.f32 %v1089_v18, %v1089_v18 }
  0xfb   : > { %v698_v20 = vmul.f32 %v482_v19, %v482_v19  ;;  %v1090_v21 = vpop.f32.mrb[2].mxu0 }
  0xfc   : > { %v1016_v22 = vpack.c.bf16 %v1090_v21, %v1089_v18  ;;  %v485_v23 = vpop.f32.mrb[3].mxu0  ;;  %v701_v28 = vmul.f32 %v1090_v21, %v1090_v21 }
  0xfd   : > { %v1011_v25 = vpack.c.bf16 %v485_v23, %v482_v19  ;;  %v684_v26 = vadd.f32 %v485_v23, %v482_v19  ;;  %v699_v27 = vmul.f32 %v485_v23, %v485_v23 }
  0xfe   : > { %1048 = vst [vmem:[%s333_s13 + $0x8] sm:$0xff] %v1016_v22  }
  0xff   : > { %1012 = vst [vmem:[%s333_s13] sm:$0xff] %v1011_v25   ;;  %v685_v29 = vadd.f32 %v1089_v18, %v684_v26  ;;  %v706_v30 = vadd.f32 %v699_v27, %v698_v20 }
 0x101   : > { %v707_v31 = vadd.f32 %v706_v30, %v700_v24  ;;  %v1093_v32 = vpop.f32.mrb[4].mxu0  ;;  %v686_v33 = vadd.f32 %v1090_v21, %v685_v29 }
 0x102   : > { %v498_v34 = vpop.f32.mrb[5].mxu0  ;;  %v704_v39 = vmul.f32 %v1093_v32, %v1093_v32 }
 0x103   : > { %v687_v35 = vadd.f32 %v686_v33, %v498_v34  ;;  %v702_v36 = vmul.f32 %v498_v34, %v498_v34  ;;  %v708_v37 = vadd.f32 %v707_v31, %v701_v28  ;;  %v1094_v38 = vpop.f32.mrb[6].mxu0 }
 0x104   : > { %v1026_v40 = vpack.c.bf16 %v1094_v38, %v1093_v32  ;;  %v501_v41 = vpop.f32.mrb[7].mxu0  ;;  %v705_v46 = vmul.f32 %v1094_v38, %v1094_v38 }
 0x105   : > { %v709_v42 = vadd.f32 %v708_v37, %v702_v36  ;;  %v1021_v43 = vpack.c.bf16 %v501_v41, %v498_v34  ;;  %v688_v44 = vadd.f32 %v687_v35, %v501_v41  ;;  %v703_v45 = vmul.f32 %v501_v41, %v501_v41 }
 0x106   : > { %1050 = vst [vmem:[%s333_s13 + $0x18] sm:$0xff] %v1026_v40  }
 0x107   : > { %1049 = vst [vmem:[%s333_s13 + $0x10] sm:$0xff] %v1021_v43   ;;  %v689_v47 = vadd.f32 %v1093_v32, %v688_v44  ;;  %v710_v48 = vadd.f32 %v709_v42, %v703_v45 }
 0x109   : > { %v690_v49 = vadd.f32 %v1094_v38, %v689_v47  ;;  %v711_v50 = vadd.f32 %v710_v48, %v704_v39 }
 0x10b   : > { %v691_v51 = vrot.slane %v690_v49, 4  ;;  %v712_v52 = vadd.f32 %v711_v50, %v705_v46 }
 0x10d   : > { %v692_v53 = vadd.f32 %v691_v51, %v690_v49  ;;  %v713_v54 = vrot.slane %v712_v52, 4 }
 0x10f   : > { %v693_v55 = vrot.slane %v692_v53, 2  ;;  %v714_v56 = vadd.f32 %v713_v54, %v712_v52 }
 0x111   : > { %v694_v57 = vadd.f32 %v693_v55, %v692_v53  ;;  %v715_v58 = vrot.slane %v714_v56, 2 }
 0x113   : > { %v695_v59 = vrot.slane %v694_v57, 1  ;;  %v716_v60 = vadd.f32 %v715_v58, %v714_v56 }
 0x115   : > { %v696_v61 = vadd.f32 %v695_v59, %v694_v57  ;;  %v717_v62 = vrot.slane %v716_v60, 1 }
 0x117   : > { %697 = vst [vmem:[%s341_s16] sm:$0x1] %v696_v61  ;;  %v718_v63 = vadd.f32 %v717_v62, %v716_v60 }
 0x119   : > { %719 = vst [vmem:[%s344_s19] sm:$0x1] %v718_v63 }
 0x15b   : > { %v1099_v0 = vpop.f32.mrb[0].mxu1 }
 0x15c   : > { %v573_v1 = vpop.f32.mrb[1].mxu1  ;;  %v736_v9 = vmul.f32 %v1099_v0, %v1099_v0 }
 0x15d   : > { %v1100_v2 = vpop.f32.mrb[2].mxu1  ;;  %v734_v5 = vmul.f32 %v573_v1, %v573_v1 }
 0x15e   : > { %v1036_v3 = vpack.c.bf16 %v1100_v2, %v1099_v0  ;;  %v576_v4 = vpop.f32.mrb[3].mxu1  ;;  %v737_v12 = vmul.f32 %v1100_v2, %v1100_v2 }
 0x15f   : > { %v1031_v6 = vpack.c.bf16 %v576_v4, %v573_v1  ;;  %v720_v7 = vadd.f32 %v576_v4, %v573_v1  ;;  %v735_v8 = vmul.f32 %v576_v4, %v576_v4 }
 0x160   : > { %1051 = vst [vmem:[%s338_s22 + $0x8] sm:$0xff] %v1036_v3  }
 0x161   : > { %1032 = vst [vmem:[%s338_s22] sm:$0xff] %v1031_v6   ;;  %v721_v10 = vadd.f32 %v1099_v0, %v720_v7  ;;  %v742_v11 = vadd.f32 %v735_v8, %v734_v5 }
 0x163   : > { %v743_v13 = vadd.f32 %v742_v11, %v736_v9  ;;  %v1103_v14 = vpop.f32.mrb[4].mxu1  ;;  %v722_v15 = vadd.f32 %v1100_v2, %v721_v10 }
 0x164   : > { %v589_v16 = vpop.f32.mrb[5].mxu1  ;;  %v740_v27 = vmul.f32 %v1103_v14, %v1103_v14 }
 0x165   : > { %v723_v17 = vadd.f32 %v722_v15, %v589_v16  ;;  %v738_v18 = vmul.f32 %v589_v16, %v589_v16  ;;  %v744_v19 = vadd.f32 %v743_v13, %v737_v12  ;;  %v1104_v20 = vpop.f32.mrb[6].mxu1 }
 0x166   : > { %v1046_v21 = vpack.c.bf16 %v1104_v20, %v1103_v14  ;;  %v592_v22 = vpop.f32.mrb[7].mxu1  ;;  %v741_v30 = vmul.f32 %v1104_v20, %v1104_v20 }
 0x167   : > { %v745_v23 = vadd.f32 %v744_v19, %v738_v18  ;;  %v1041_v24 = vpack.c.bf16 %v592_v22, %v589_v16  ;;  %v724_v25 = vadd.f32 %v723_v17, %v592_v22  ;;  %v739_v26 = vmul.f32 %v592_v22, %v592_v22 }
 0x168   : > { %1053 = vst [vmem:[%s338_s22 + $0x18] sm:$0xff] %v1046_v21  }
 0x169   : > { %1052 = vst [vmem:[%s338_s22 + $0x10] sm:$0xff] %v1041_v24   ;;  %v725_v28 = vadd.f32 %v1103_v14, %v724_v25  ;;  %v746_v29 = vadd.f32 %v745_v23, %v739_v26 }
 0x16b   : > { %v726_v31 = vadd.f32 %v1104_v20, %v725_v28  ;;  %v747_v32 = vadd.f32 %v746_v29, %v740_v27 }
 0x16d   : > { %v727_v33 = vrot.slane %v726_v31, 4  ;;  %v748_v34 = vadd.f32 %v747_v32, %v741_v30 }
 0x16f   : > { %v728_v35 = vadd.f32 %v727_v33, %v726_v31  ;;  %v749_v36 = vrot.slane %v748_v34, 4 }
 0x171   : > { %v729_v37 = vrot.slane %v728_v35, 2  ;;  %v750_v38 = vadd.f32 %v749_v36, %v748_v34 }
 0x173   : > { %v730_v39 = vadd.f32 %v729_v37, %v728_v35  ;;  %v751_v40 = vrot.slane %v750_v38, 2 }
 0x175   : > { %v731_v41 = vrot.slane %v730_v39, 1  ;;  %v752_v42 = vadd.f32 %v751_v40, %v750_v38 }
 0x177   : > { %v732_v43 = vadd.f32 %v731_v41, %v730_v39  ;;  %v753_v44 = vrot.slane %v752_v42, 1 }
 0x179   : > { %733 = vst [vmem:[%s347_s24] sm:$0x1] %v732_v43  ;;  %v754_v45 = vadd.f32 %v753_v44, %v752_v42 }
 0x17b   : > { %755 = vst [vmem:[%s350_s29] sm:$0x1] %v754_v45 }
 0x17c PF: > { %s19_s27 = sadd.s32 1, %s1133_s27  }
 0x17d   : > { %p16_p4 = scmp.ge.s32.totalorder %s19_s27, 4  }
 0x17f   :  { %18 = sbr.rel (!%p16_p4) target bundleno = 1 (0x1), region = 122 }

// kernel: restnet_down_block.5
= control target key start
LH: loop header
LB: loop body
LE: loop exit
PB: predicated region body
PF: predicated region fallthrough
CT: control target
= control target key end

     0   :  { %s564_s21 = smov 0   ;;  %s662_s0 = inlined_call_operand.vmem [shape: bf16[2,64,128], index: 0, kind: input, shape index: {}]   ;;  %s663_s1 = inlined_call_operand.vmem [shape: f32[1,128], index: 1, kind: input, shape index: {}]   ;;  %s664_s2 = inlined_call_operand.vmem [shape: f32[1,128], index: 2, kind: input, shape index: {}]   ;;  %s665_s3 = inlined_call_operand.vmem [shape: bf16[2,64,128], index: 3, kind: input, shape index: {}]   ;;  %s666_s4 = inlined_call_operand.vmem [shape: f32[1,128], index: 4, kind: input, shape index: {}]   ;;  %s667_s5 = inlined_call_operand.vmem [shape: f32[1,128], index: 5, kind: input, shape index: {}]   ;;  %s668_s6 = inlined_call_operand.vmem [shape: f32[2,64,128], index: 6, kind: output, shape index: {}]  }
   0x1 LB: > { %s455_s22 = sadd.s32 4294967295, %s527_s21   ;;  %p459_p0 = scmp.ge.s32.totalorder %s527_s21, 1  ;;  %s527_s21 = sphi %s564_s21, %s16_s21  }
   0x2   : > { %p222_p1 = scmp.lt.s32.totalorder %s527_s21, 3 }
   0x4   : > { %p223_p2 = pnand %p459_p0, %p222_p1 }
   0x5   : > { %p257_p3 = scmp.lt.s32.totalorder (!%p223_p2), %s455_s22, 1  ;;  %v588_v0 = vld [vmem:[%s663_s1] ss:$0 sm:$0xff] (!%p223_p2) }
   0x6   : > { %226 = sbr.rel (%p223_p2) target bundleno = 39 (0x27), region = 44  ;;  %v593_v1 = vld [vmem:[%s666_s4] ss:$0 sm:$0xff] (!%p223_p2) }
   0x7   : > { %v602_v10 = vld [vmem:[%s664_s2] ss:$0 sm:$0xff] (!%p223_p2) }
   0x8   : > { %v607_v11 = vld [vmem:[%s667_s5] ss:$0 sm:$0xff] (!%p223_p2) }
   0xd   : > { %s670_s22 = smov (!%p257_p3, %s455_s22), 1 }
   0xe   : > { %s472_s23 = sshll.u32 %s670_s22, 5  ;;  %s474_s14 = sshll.u32 %s670_s22, 6 }
   0xf   : > { %s578_s26 = scalar_lea.vmem %s662_s0, %s472_s23  ;;  %s583_s29 = scalar_lea.vmem %s665_s3, %s472_s23 }
  0x10   : > { %v476_v2 = vld [vmem:[%s578_s26] sm:$0xff]   ;;  %v507_v4 = vld [vmem:[%s578_s26 + $0x8] sm:$0xff]   ;;  %v508_v24 = vld [vmem:[%s578_s26 + $0x10] sm:$0xff]   ;;  %s631_s17 = scalar_lea.vmem %s668_s6, %s474_s14 }
  0x11   : > { %v492_v3 = vld [vmem:[%s583_s29] sm:$0xff]   ;;  %v477_v5 = vunpack.c.l.bf16 %v476_v2  ;;  %v478_v7 = vunpack.c.h.bf16 %v476_v2  ;;  %v510_v9 = vld [vmem:[%s583_s29 + $0x8] sm:$0xff]   ;;  %v481_v12 = vunpack.c.l.bf16 %v507_v4  ;;  %v482_v14 = vunpack.c.h.bf16 %v507_v4  ;;  %v511_v25 = vld [vmem:[%s583_s29 + $0x10] sm:$0xff]  }
  0x12   : > { %v493_v6 = vunpack.c.l.bf16 %v492_v3  ;;  %v494_v8 = vunpack.c.h.bf16 %v492_v3  ;;  %v497_v13 = vunpack.c.l.bf16 %v510_v9  ;;  %v498_v15 = vunpack.c.h.bf16 %v510_v9  ;;  %v509_v42 = vld [vmem:[%s578_s26 + $0x18] sm:$0xff]  }
  0x13   : > { %v295_v16 = vmul.f32 %v477_v5, %v588_v0  ;;  %v296_v18 = vmul.f32 %v478_v7, %v588_v0  ;;  %v297_v20 = vmul.f32 %v481_v12, %v588_v0  ;;  %v298_v22 = vmul.f32 %v482_v14, %v588_v0  ;;  %v512_v43 = vld [vmem:[%s583_s29 + $0x18] sm:$0xff]  }
  0x14   : > { %v341_v17 = vmul.f32 %v493_v6, %v593_v1  ;;  %v342_v19 = vmul.f32 %v494_v8, %v593_v1  ;;  %v343_v21 = vmul.f32 %v497_v13, %v593_v1  ;;  %v344_v23 = vmul.f32 %v498_v15, %v593_v1 }
  0x15   : > { %v310_v26 = vadd.f32 %v602_v10, %v295_v16  ;;  %v311_v28 = vadd.f32 %v602_v10, %v296_v18  ;;  %v312_v30 = vadd.f32 %v602_v10, %v297_v20  ;;  %v313_v32 = vadd.f32 %v602_v10, %v298_v22 }
  0x16   : > { %v356_v27 = vadd.f32 %v607_v11, %v341_v17  ;;  %v357_v29 = vadd.f32 %v607_v11, %v342_v19  ;;  %v358_v31 = vadd.f32 %v607_v11, %v343_v21  ;;  %v359_v33 = vadd.f32 %v607_v11, %v344_v23 }
  0x17   : > { %v485_v36 = vunpack.c.l.bf16 %v508_v24  ;;  %v501_v37 = vunpack.c.l.bf16 %v511_v25  ;;  %v486_v40 = vunpack.c.h.bf16 %v508_v24  ;;  %v502_v41 = vunpack.c.h.bf16 %v511_v25 }
  0x18   : > { %v364_v34 = vadd.f32 %v356_v27, %v310_v26  ;;  %v365_v35 = vadd.f32 %v357_v29, %v311_v28  ;;  %v366_v38 = vadd.f32 %v358_v31, %v312_v30  ;;  %v367_v39 = vadd.f32 %v359_v33, %v313_v32 }
  0x19   : > { %v299_v46 = vmul.f32 %v485_v36, %v588_v0  ;;  %v345_v47 = vmul.f32 %v501_v37, %v593_v1  ;;  %v300_v50 = vmul.f32 %v486_v40, %v588_v0  ;;  %v346_v51 = vmul.f32 %v502_v41, %v593_v1 }
  0x1a   : > { %v372_v44 = vmax.f32 %v364_v34, 0.0  ;;  %v373_v45 = vmax.f32 %v365_v35, 0.0  ;;  %v374_v48 = vmax.f32 %v366_v38, 0.0  ;;  %v375_v49 = vmax.f32 %v367_v39, 0.0 }
  0x1b   : > { %v314_v52 = vadd.f32 %v602_v10, %v299_v46  ;;  %v360_v53 = vadd.f32 %v607_v11, %v345_v47  ;;  %v489_v54 = vunpack.c.l.bf16 %v509_v42  ;;  %v505_v55 = vunpack.c.l.bf16 %v512_v43 }
  0x1c   : > { %380 = vst [vmem:[%s631_s17] sm:$0xff] %v372_v44  ;;  %381 = vst [vmem:[%s631_s17 + $0x8] sm:$0xff] %v373_v45  ;;  %v315_v56 = vadd.f32 %v602_v10, %v300_v50  ;;  %v361_v57 = vadd.f32 %v607_v11, %v346_v51  ;;  %v490_v58 = vunpack.c.h.bf16 %v509_v42  ;;  %v506_v59 = vunpack.c.h.bf16 %v512_v43 }
  0x1d   : > { %382 = vst [vmem:[%s631_s17 + $0x10] sm:$0xff] %v374_v48  ;;  %383 = vst [vmem:[%s631_s17 + $0x18] sm:$0xff] %v375_v49  ;;  %v368_v60 = vadd.f32 %v360_v53, %v314_v52  ;;  %v301_v61 = vmul.f32 %v489_v54, %v588_v0  ;;  %v347_v62 = vmul.f32 %v505_v55, %v593_v1 }
  0x1e   : > { %v369_v63 = vadd.f32 %v361_v57, %v315_v56  ;;  %v302_v2 = vmul.f32 %v490_v58, %v588_v0  ;;  %v348_v3 = vmul.f32 %v506_v59, %v593_v1 }
  0x1f   : > { %v376_v4 = vmax.f32 %v368_v60, 0.0  ;;  %v316_v5 = vadd.f32 %v602_v10, %v301_v61  ;;  %v362_v6 = vadd.f32 %v607_v11, %v347_v62 }
  0x20   : > { %v377_v7 = vmax.f32 %v369_v63, 0.0  ;;  %v317_v8 = vadd.f32 %v602_v10, %v302_v2  ;;  %v363_v9 = vadd.f32 %v607_v11, %v348_v3 }
  0x21   : > { %384 = vst [vmem:[%s631_s17 + $0x20] sm:$0xff] %v376_v4  ;;  %v370_v12 = vadd.f32 %v362_v6, %v316_v5 }
  0x22   : > { %385 = vst [vmem:[%s631_s17 + $0x28] sm:$0xff] %v377_v7  ;;  %v371_v13 = vadd.f32 %v363_v9, %v317_v8 }
  0x23   : > { %v378_v14 = vmax.f32 %v370_v12, 0.0 }
  0x24   : > { %v379_v15 = vmax.f32 %v371_v13, 0.0 }
  0x25   : > { %386 = vst [vmem:[%s631_s17 + $0x30] sm:$0xff] %v378_v14 }
  0x26   : > { %387 = vst [vmem:[%s631_s17 + $0x38] sm:$0xff] %v379_v15 }
  0x27 PF: > { %s16_s21 = sadd.s32 1, %s527_s21  }
  0x28   : > { %p13_p4 = scmp.ge.s32.totalorder %s16_s21, 4  }
  0x2a   :  { %15 = sbr.rel (!%p13_p4) target bundleno = 1 (0x1), region = 77 }

// kernel: restnet_down_block.4
= control target key start
LH: loop header
LB: loop body
LE: loop exit
PB: predicated region body
PF: predicated region fallthrough
CT: control target
= control target key end

     0   :  { %s3701_s27 = smov 0   ;;  %s4471_s0 = inlined_call_operand.vmem [shape: bf16[2,110,128], index: 0, kind: input, shape index: {}]   ;;  %s4472_s1 = inlined_call_operand.vmem [shape: f32[1,128], index: 1, kind: input, shape index: {}]   ;;  %s4473_s2 = inlined_call_operand.vmem [shape: f32[1,128], index: 2, kind: input, shape index: {}]   ;;  %s4474_s3 = inlined_call_operand.vmem [shape: bf16[9,128,128], index: 3, kind: input, shape index: {}]   ;;  %s4475_s4 = inlined_call_operand.vmem [shape: f32[1,110,1], index: 4, kind: input, shape index: {}]   ;;  %s4476_s5 = inlined_call_operand.vmem [shape: f32[1,80,1], index: 5, kind: input, shape index: {}]   ;;  %s4477_s6 = inlined_call_operand.vmem [shape: bf16[2,80,128], index: 6, kind: output, shape index: {0}]   ;;  %s4478_s7 = inlined_call_operand.vmem [shape: f32[2,1,128], index: 7, kind: output, shape index: {1}]   ;;  %s4479_s8 = inlined_call_operand.vmem [shape: f32[2,1,128], index: 8, kind: output, shape index: {2}]  }
   0x1 LB: > { %s2557_s28 = sadd.s32 4294967295, %s3651_s27   ;;  %p2561_p0 = scmp.ge.s32.totalorder %s3651_s27, 1  ;;  %s3651_s27 = sphi %s3701_s27, %s19_s27  }
   0x2   : > { %p267_p1 = scmp.lt.s32.totalorder %s3651_s27, 3 }
   0x4   : > { %p268_p2 = pnand %p2561_p0, %p267_p1 }
   0x5   : > { %v410_v0 = vld [vmem:[%s4475_s4 + $0x10] sm:$0xff] (!%p268_p2)  ;;  %v408_v1 = vld [vmem:[%s4475_s4] sm:$0xff] (!%p268_p2)  ;;  %v3653_v2 = vmov (!%p268_p2), 0   ;;  %v411_v3 = vld [vmem:[%s4475_s4 + $0x18] sm:$0xff] (!%p268_p2)  ;;  %v3654_v5 = vmov (!%p268_p2), 0.0   ;;  %vm3655_vm0 = vmmov (!%p268_p2), 0  }
   0x6   : > { %271 = sbr.rel (%p268_p2) target bundleno = 583 (0x247), region = 44  ;;  %3549 = vset.pattern.permute.xlu1 (!%p268_p2), %v3653_v2  ;;  %3548 = vset.pattern.permute.xlu0 (!%p268_p2), %v3653_v2  ;;  %v409_v4 = vld [vmem:[%s4475_s4 + $0x8] sm:$0xff] (!%p268_p2)  ;;  %v412_v7 = vld [vmem:[%s4475_s4 + $0x20] sm:$0xff] (!%p268_p2)  ;;  %v415_v10 = vld [vmem:[%s4475_s4 + $0x38] sm:$0xff] (!%p268_p2)  ;;  %p307_p3 = scmp.lt.s32.totalorder (!%p268_p2), %s2557_s28, 1  ;;  %vm966_vm3 = vcmask (!%p268_p2), 1046528  }
   0x7   : > { %434 = vperm.xlu1 (!%p268_p2), %3549, %v410_v0   ;;  %424 = vperm.xlu0 (!%p268_p2), %3548, %v408_v1   ;;  %v413_v6 = vld [vmem:[%s4475_s4 + $0x28] sm:$0xff] (!%p268_p2)  ;;  %v3550_v8 = vld [vmem:[%s4474_s3 + $0x40] sm:$0xff] (!%p268_p2)   ;;  %v414_v11 = vld [vmem:[%s4475_s4 + $0x30] sm:$0xff] (!%p268_p2)  ;;  %vm648_vm1 = vsmask.f32 (!%p268_p2), 7424  ;;  %vm2132_vm4 = vcmask (!%p268_p2), 1044480  }
   0x8   : > { %3049 = vmatprep.subr.bf16.mxu1 (!%p268_p2), %v3654_v5  ;;  %3193 = vmatprep.subr.bf16.mxu0 (!%p268_p2), %v3654_v5  ;;  %v3551_v9 = vld [vmem:[%s4474_s3 + $0x100] sm:$0xff] (!%p268_p2)   ;;  %v3552_v12 = vld [vmem:[%s4474_s3 + $0x48] sm:$0xff] (!%p268_p2)   ;;  %v3554_v16 = vld [vmem:[%s4474_s3 + $0x50] sm:$0xff] (!%p268_p2)   ;;  %vm1338_vm2 = vsmask.f32 (!%p268_p2), 6400  ;;  %vm1549_vm5 = vcmask (!%p268_p2), 1045504  }
   0x9   : > { %3050 = vmatpush3.bf16.msra.mxu1 (!%p268_p2), %v3550_v8  ;;  %3194 = vmatpush3.bf16.msra.mxu0 (!%p268_p2), %v3551_v9  ;;  %v417_v13 = vld [vmem:[%s4475_s4 + $0x48] sm:$0xff] (!%p268_p2)  ;;  %v416_v14 = vld [vmem:[%s4475_s4 + $0x40] sm:$0xff] (!%p268_p2)  ;;  %v3555_v17 = vld [vmem:[%s4474_s3 + $0x110] sm:$0xff] (!%p268_p2)   ;;  %vm1921_vm6 = vsmask.f32 (!%p268_p2), 5376 }
   0xa   : > { %3051 = vmatprep.subr.bf16.mxu1 (!%p268_p2), %v3654_v5  ;;  %3195 = vmatprep.subr.bf16.mxu0 (!%p268_p2), %v3654_v5  ;;  %v3553_v15 = vld [vmem:[%s4474_s3 + $0x108] sm:$0xff] (!%p268_p2)   ;;  %v419_v18 = vld [vmem:[%s4475_s4 + $0x58] sm:$0xff] (!%p268_p2)  ;;  %v418_v19 = vld [vmem:[%s4475_s4 + $0x50] sm:$0xff] (!%p268_p2) }
   0xb   : > { %439 = vperm.xlu1 (!%p268_p2), %3549, %v411_v3   ;;  %429 = vperm.xlu0 (!%p268_p2), %3548, %v409_v4   ;;  %v3556_v20 = vld [vmem:[%s4474_s3 + $0x58] sm:$0xff] (!%p268_p2)   ;;  %v2330_v22 = vld [vmem:[%s4476_s5] sm:$0xff] (!%p268_p2)  ;;  %v2332_v26 = vld [vmem:[%s4476_s5 + $0x10] sm:$0xff] (!%p268_p2) }
   0xc   : > { %v3557_v21 = vld [vmem:[%s4474_s3 + $0x118] sm:$0xff] (!%p268_p2)   ;;  %v420_v23 = vld [vmem:[%s4475_s4 + $0x60] sm:$0xff] (!%p268_p2)  ;;  %v2331_v27 = vld [vmem:[%s4476_s5 + $0x8] sm:$0xff] (!%p268_p2)  ;;  %3065 = vmatprep.mubr.msk.bf16.mxu1 (!%p268_p2), %vm3655_vm0, %v3654_v5  ;;  %3209 = vmatprep.mubr.msk.bf16.mxu0 (!%p268_p2), %vm3655_vm0, %v3654_v5 }
   0xd   : > { %3052 = vmatpush3.bf16.msra.mxu1 %v3552_v12  ;;  %3196 = vmatpush3.bf16.msra.mxu0 %v3553_v15  ;;  %v3558_v24 = vld [vmem:[%s4474_s3 + $0x60] sm:$0xff]   ;;  %v3560_v28 = vld [vmem:[%s4474_s3 + $0x68] sm:$0xff]   ;;  %v2333_v31 = vld [vmem:[%s4476_s5 + $0x18] sm:$0xff]  ;;  %s4481_s28 = smov (!%p307_p3, %s2557_s28), 1 }
   0xe   : > { %3053 = vmatprep.subr.bf16.mxu1 %v3654_v5  ;;  %3197 = vmatprep.subr.bf16.mxu0 %v3654_v5  ;;  %v3559_v25 = vld [vmem:[%s4474_s3 + $0x120] sm:$0xff]   ;;  %v3561_v29 = vld [vmem:[%s4474_s3 + $0x128] sm:$0xff]   ;;  %v3562_v32 = vld [vmem:[%s4474_s3 + $0x70] sm:$0xff]   ;;  %s3535_s29 = smul.u32 56, %s4481_s28  ;;  %s319_s13 = scalar_lea.vmem %s4478_s7, %s4481_s28 }
   0xf   : > { %449 = vperm.xlu1 %3549, %v413_v6   ;;  %444 = vperm.xlu0 %3548, %v412_v7   ;;  %v2334_v30 = vld [vmem:[%s4476_s5 + $0x20] sm:$0xff]  ;;  %v3563_v33 = vld [vmem:[%s4474_s3 + $0x130] sm:$0xff]   ;;  %v2335_v35 = vld [vmem:[%s4476_s5 + $0x28] sm:$0xff]  ;;  %s322_s16 = scalar_lea.vmem %s4479_s8, %s4481_s28 }
  0x10   : > { %v2336_v34 = vld [vmem:[%s4476_s5 + $0x30] sm:$0xff]  ;;  %v3564_v36 = vld [vmem:[%s4474_s3 + $0x78] sm:$0xff]   ;;  %v2338_v38 = vld [vmem:[%s4476_s5 + $0x40] sm:$0xff]  ;;  %s3861_s10 = scalar_lea.vmem %s4471_s0, %s3535_s29  ;;  %s3536_s29 = smul.u32 40, %s4481_s28 }
  0x11   : > { %3054 = vmatpush3.bf16.msra.mxu1 %v3554_v16  ;;  %3198 = vmatpush3.bf16.msra.mxu0 %v3555_v17  ;;  %v3567_v37 = vld [vmem:[%s4474_s3 + $0x138] sm:$0xff]   ;;  %v421_v40 = vld [vmem:[%s4475_s4 + $0x68] sm:$0x3f]  ;;  %v2840_v43 = vld [vmem:[%s3861_s10] sm:$0xff]  }
  0x12   : > { %3055 = vmatprep.subr.bf16.mxu1 %v3654_v5  ;;  %3199 = vmatprep.subr.bf16.mxu0 %v3654_v5  ;;  %v2337_v39 = vld [vmem:[%s4476_s5 + $0x38] sm:$0xff]  ;;  %v2339_v41 = vld [vmem:[%s4476_s5 + $0x48] sm:$0xff]  ;;  %v2919_v44 = vld [vmem:[%s3861_s10 + $0x10] sm:$0xff]   ;;  %v2841_v46 = vunpack.c.l.bf16 %v2840_v43  ;;  %v2842_v48 = vunpack.c.h.bf16 %v2840_v43 }
  0x13   : > { %459 = vperm.xlu1 %3549, %v415_v10   ;;  %454 = vperm.xlu0 %3548, %v414_v11   ;;  %v2918_v42 = vld [vmem:[%s3861_s10 + $0x8] sm:$0xff]   ;;  %v3869_v49 = vld [vmem:[%s4472_s1] ss:$0 sm:$0xff]  ;;  %v2850_v50 = vunpack.c.h.bf16 %v2919_v44  ;;  %v2849_v51 = vunpack.c.l.bf16 %v2919_v44  ;;  %v2920_v52 = vld [vmem:[%s3861_s10 + $0x18] sm:$0xff]  }
  0x14   : > { %v2845_v45 = vunpack.c.l.bf16 %v2918_v42  ;;  %v2846_v47 = vunpack.c.h.bf16 %v2918_v42  ;;  %v359_v54 = vmul.f32 %v2841_v46, %v3869_v49  ;;  %v360_v56 = vmul.f32 %v2842_v48, %v3869_v49  ;;  %v3879_v57 = vld [vmem:[%s4473_s2] ss:$0 sm:$0xff]  ;;  %v2922_v12 = vld [vmem:[%s3861_s10 + $0x28] sm:$0xff]  }
  0x15   : > { %3056 = vmatpush3.bf16.msra.mxu1 %v3556_v20  ;;  %3200 = vmatpush3.bf16.msra.mxu0 %v3557_v21  ;;  %v364_v58 = vmul.f32 %v2850_v50, %v3869_v49  ;;  %v363_v59 = vmul.f32 %v2849_v51, %v3869_v49  ;;  %v2854_v60 = vunpack.c.h.bf16 %v2920_v52  ;;  %v2853_v61 = vunpack.c.l.bf16 %v2920_v52  ;;  %v2921_v2 = vld [vmem:[%s3861_s10 + $0x20] sm:$0xff]  }
  0x16   : > { %3057 = vmatprep.subr.bf16.mxu1 %v3654_v5  ;;  %3201 = vmatprep.subr.bf16.mxu0 %v3654_v5  ;;  %v361_v53 = vmul.f32 %v2845_v45, %v3869_v49  ;;  %v362_v55 = vmul.f32 %v2846_v47, %v3869_v49  ;;  %v380_v63 = vadd.f32 %v3879_v57, %v359_v54  ;;  %v2858_v10 = vunpack.c.h.bf16 %v2921_v2 }
  0x17   : > { %469 = vperm.xlu1 %3549, %v417_v13   ;;  %464 = vperm.xlu0 %3548, %v416_v14   ;;  %v381_v1 = vadd.f32 %v3879_v57, %v360_v56  ;;  %v385_v3 = vadd.f32 %v3879_v57, %v364_v58  ;;  %v384_v4 = vadd.f32 %v3879_v57, %v363_v59  ;;  %v2857_v11 = vunpack.c.l.bf16 %v2921_v2 }
  0x18   : > { %v382_v62 = vadd.f32 %v3879_v57, %v361_v53  ;;  %v383_v0 = vadd.f32 %v3879_v57, %v362_v55  ;;  %v366_v6 = vmul.f32 %v2854_v60, %v3869_v49  ;;  %v365_v9 = vmul.f32 %v2853_v61, %v3869_v49 }
  0x19   : > { %3058 = vmatpush3.bf16.msra.mxu1 %v3558_v24  ;;  %3202 = vmatpush3.bf16.msra.mxu0 %v3559_v25  ;;  %v394_v14 = vmax.f32 %v380_v63, 0.0  ;;  %v395_v16 = vmax.f32 %v381_v1, 0.0  ;;  %v399_v17 = vmax.f32 %v385_v3, 0.0  ;;  %v2862_v20 = vunpack.c.h.bf16 %v2922_v12 }
  0x1a   : > { %3059 = vmatprep.subr.bf16.mxu1 %v3654_v5  ;;  %3203 = vmatprep.subr.bf16.mxu0 %v3654_v5  ;;  %v396_v13 = vmax.f32 %v382_v62, 0.0  ;;  %v397_v15 = vmax.f32 %v383_v0, 0.0  ;;  %v368_v24 = vmul.f32 %v2858_v10, %v3869_v49  ;;  %v367_v25 = vmul.f32 %v2857_v11, %v3869_v49 }
  0x1b   : > { %479 = vperm.xlu1 %3549, %v419_v18   ;;  %474 = vperm.xlu0 %3548, %v418_v19   ;;  %v398_v18 = vmax.f32 %v384_v4, 0.0  ;;  %v387_v19 = vadd.f32 %v3879_v57, %v366_v6 }
  0x1c   : > { %v388_v43 = vadd.f32 %v3879_v57, %v367_v25 }
  0x1d   : > { %3060 = vmatpush3.bf16.msra.mxu1 %v3560_v28  ;;  %3204 = vmatpush3.bf16.msra.mxu0 %v3561_v29 }
  0x1e   : > { %3061 = vmatprep.subr.bf16.mxu1 %v3654_v5  ;;  %3205 = vmatprep.subr.bf16.mxu0 %v3654_v5  ;;  %v402_v54 = vmax.f32 %v388_v43, 0.0 }
  0x1f   : > { %2342 = vperm.xlu1 %3549, %v2330_v22   ;;  %484 = vperm.xlu0 %3548, %v420_v23   ;;  %v386_v23 = vadd.f32 %v3879_v57, %v365_v9 }
  0x21   : > { %3062 = vmatpush3.bf16.msra.mxu1 %v3562_v32  ;;  %3206 = vmatpush3.bf16.msra.mxu0 %v3563_v33 }
  0x22   : > { %3063 = vmatprep.subr.bf16.mxu1 %v3654_v5  ;;  %3207 = vmatprep.subr.bf16.mxu0 %v3654_v5 }
  0x23   : > { %2352 = vperm.xlu1 %3549, %v2332_v26   ;;  %2347 = vperm.xlu0 %3548, %v2331_v27   ;;  %v2861_v26 = vunpack.c.l.bf16 %v2922_v12 }
  0x25   : > { %3064 = vmatpush3.bf16.msra.mxu1 %v3564_v36  ;;  %3208 = vmatpush3.bf16.msra.mxu0 %v3567_v37  ;;  %v401_v37 = vmax.f32 %v387_v19, 0.0  ;;  %v369_v44 = vmul.f32 %v2861_v26, %v3869_v49  ;;  %v3572_v26 = vld [vmem:[%s4474_s3] sm:$0xff]  }
  0x26   : > { %3229 = vmatprep.subr.bf16.mxu0 %v3654_v5  ;;  %3085 = vmatprep.subr.bf16.mxu1 %v3654_v5 }
  0x27   : > { %2362 = vperm.xlu1 %3549, %v2334_v30   ;;  %2357 = vperm.xlu0 %3548, %v2333_v31   ;;  %v336_v31 = vld [vmem:[%s3861_s10 + $0x30] sm:$0xf]  ;;  %v390_v55 = vadd.f32 %v3879_v57, %v369_v44  ;;  %s4432_s10 = scalar_lea.vmem %s4477_s6, %s3536_s29 }
  0x29   : > { %v404_v2 = vmax.f32 %v390_v55, 0.0 }
  0x2b   : > { %2372 = vperm.xlu1 %3549, %v2336_v34   ;;  %2367 = vperm.xlu0 %3548, %v2335_v35   ;;  %v370_v34 = vmul.f32 %v2862_v20, %v3869_v49 }
  0x2d   : > { %v391_v46 = vadd.f32 %v3879_v57, %v370_v34 }
  0x2f   : > { %2382 = vperm.xlu1 %3549, %v2338_v38   ;;  %2377 = vperm.xlu0 %3548, %v2337_v39   ;;  %v400_v38 = vmax.f32 %v386_v23, 0.0  ;;  %v389_v39 = vadd.f32 %v3879_v57, %v368_v24  ;;  %v405_v58 = vmax.f32 %v391_v46, 0.0 }
  0x31   : > { %v403_v50 = vmax.f32 %v389_v39, 0.0  ;;  %v3570_v39 = vld [vmem:[%s4474_s3 + $0x140] sm:$0xff]  }
  0x33   : > { %489 = vperm.xlu1 %3549, %v421_v40   ;;  %2387 = vperm.xlu0 %3548, %v2339_v41   ;;  %v350_v40 = vunpack.c.l.bf16 %v336_v31 }
  0x35   : > { %v371_v51 = vmul.f32 %v3869_v49, %v350_v40  ;;  %v3575_v40 = vld [vmem:[%s4474_s3 + $0x8] sm:$0xff]  }
  0x37   : > { %v392_v61 = vadd.f32 %v3879_v57, %v371_v51 }
  0x39   : > { %v406_v11 = vmax.f32 %v392_v61, 0.0 }
  0x86   : > { %v435_v7 = vpop.permute.xlu1 %434  ;;  %v425_v8 = vpop.permute.xlu0 %424 }
  0x87   : > { %v494_v27 = vmul.f32 %v435_v7, %v396_v13  ;;  %v492_v28 = vmul.f32 %v425_v8, %v394_v14 }
  0x8a   : > { %v440_v21 = vpop.permute.xlu1 %439  ;;  %v430_v22 = vpop.permute.xlu0 %429 }
  0x8b   : > { %v495_v29 = vmul.f32 %v440_v21, %v397_v15  ;;  %v493_v30 = vmul.f32 %v430_v22, %v395_v16 }
  0x8d   : > { %v2871_v32 = vpack.c.bf16 %v495_v29, %v494_v27  ;;  %v2866_v33 = vpack.c.bf16 %v493_v30, %v492_v28 }
  0x8e   : > { %v450_v35 = vpop.permute.xlu1 %449  ;;  %v445_v36 = vpop.permute.xlu0 %444 }
  0x8f   : > { %2923 = vst [vmem:[#allocation2 + $0x8] sm:$0xff] %v2871_v32   ;;  %2867 = vst [vmem:[#allocation2] sm:$0xff] %v2866_v33   ;;  %v497_v41 = vmul.f32 %v450_v35, %v399_v17  ;;  %v496_v42 = vmul.f32 %v445_v36, %v398_v18 }
  0x91   : > { %v2876_v45 = vpack.c.bf16 %v497_v41, %v496_v42 }
  0x92   : > { %v460_v47 = vpop.permute.xlu1 %459  ;;  %v455_v48 = vpop.permute.xlu0 %454 }
  0x93   : > { %2924 = vst [vmem:[#allocation2 + $0x10] sm:$0xff] %v2876_v45   ;;  %v499_v52 = vmul.f32 %v460_v47, %v401_v37  ;;  %v498_v53 = vmul.f32 %v455_v48, %v400_v38 }
  0x95   : > { %v2881_v56 = vpack.c.bf16 %v499_v52, %v498_v53  ;;  %v3573_v53 = vld [vmem:[%s4474_s3 + $0x148] sm:$0xff]  }
  0x96   : > { %v470_v59 = vpop.permute.xlu1 %469  ;;  %v465_v60 = vpop.permute.xlu0 %464  ;;  %v576_v62 = vld [vmem:[#allocation2] sm:$0xf]  ;;  %v3906_v63 = vld [vmem:[#allocation2 + $0x4] sm:$0xf]  ;;  %v3911_v3 = vld [vmem:[#allocation2 + $0x8] sm:$0xff]  }
  0x97   : > { %2925 = vst [vmem:[#allocation2 + $0x18] sm:$0xff] %v2881_v56   ;;  %v501_v0 = vmul.f32 %v470_v59, %v403_v50  ;;  %v500_v1 = vmul.f32 %v465_v60, %v402_v54  ;;  %v3909_v49 = vcombine.low %v576_v62, %v3906_v63  ;;  %v1114_v4 = vld [vmem:[#allocation2 + $0x4] sm:$0xe]  ;;  %v3913_v6 = vld [vmem:[#allocation2 + $0x8] sm:$0xf]  ;;  %v657_v57 = vshll.u32 %v3911_v3, 16 }
  0x98   : > { %v3918_v12 = vcombine.low %v1114_v4, %v3913_v6  ;;  %v661_v46 = vshrl.u32 %v3911_v3, 16  ;;  %v945_v56 = vld [vmem:[#allocation2] sm:$0xe]  ;;  %v3578_v60 = vld [vmem:[%s4474_s3 + $0x10] sm:$0xff]  }
  0x99   : > { %v2886_v7 = vpack.c.bf16 %v501_v0, %v500_v1  ;;  %v652_v8 = vshll.u32 %v3909_v49, 16  ;;  %v650_v16 = vshrl.u32 %v3909_v49, 16  ;;  %v659_v25 = vrot.slane %v657_v57, 1  ;;  %v3576_v1 = vld [vmem:[%s4474_s3 + $0x150] sm:$0xff]  }
  0x9a   : > { %v480_v9 = vpop.permute.xlu1 %479  ;;  %v475_v10 = vpop.permute.xlu0 %474  ;;  %v3920_v13 = vld [vmem:[#allocation2 + $0xc] sm:$0xff]   ;;  %v1340_v19 = vshrl.u32 %v3918_v12, 16  ;;  %v1343_v20 = vshll.u32 %v3918_v12, 16 }
  0x9b   : > { %2926 = vst [vmem:[#allocation2 + $0x20] sm:$0xff] %v2886_v7   ;;  %v503_v14 = vmul.f32 %v480_v9, %v405_v58  ;;  %v502_v15 = vmul.f32 %v475_v10, %v404_v2  ;;  %v654_v17 = vrot.slane %v652_v8, 1  ;;  %v3923_v18 = vld [vmem:[#allocation2 + $0x10] sm:$0xff]   ;;  %v1348_v21 = vshrl.u32 %v3920_v13, 16  ;;  %v3581_v7 = vld [vmem:[%s4474_s3 + $0x18] sm:$0xff]  }
  0x9c   : > { %v1351_v22 = vshll.u32 %v3920_v13, 16  ;;  %v1342_v29 = vrot.slane %v1340_v19, 1  ;;  %v1345_v30 = vrot.slane %v1343_v20, 2  ;;  %v665_v35 = vshll.u32 %v3923_v18, 16 }
  0x9d   : > { %v2891_v23 = vpack.c.bf16 %v503_v14, %v502_v15  ;;  %v655_v24 = vor.u32 %v654_v17, %v650_v16  ;;  %v1350_v31 = vrot.slane %v1348_v21, 1  ;;  %v663_v54 = vor.u32 %v661_v46, %v659_v25  ;;  %v3579_v15 = vld [vmem:[%s4474_s3 + $0x158] sm:$0xff]  }
  0x9e   : > { %v3932_v27 = vpop.permute.xlu1 %2342  ;;  %v485_v28 = vpop.permute.xlu0 %484  ;;  %v1353_v32 = vrot.slane %v1351_v22, 2  ;;  %v3936_v36 = vld [vmem:[#allocation2 + $0x14] sm:$0xff]   ;;  %v1346_v37 = vor.u32 %v1345_v30, %v1342_v29  ;;  %v667_v48 = vrot.slane %v665_v35, 1  ;;  %v2634_v2 = vcombine.low %v945_v56, %v3906_v63  ;;  %v3584_v22 = vld [vmem:[%s4474_s3 + $0x20] sm:$0xff]  }
  0x9f   : > { %2927 = vst [vmem:[#allocation2 + $0x28] sm:$0xff] %v2891_v23   ;;  %v504_v33 = vmul.f32 %v485_v28, %v406_v11  ;;  %v660_v34 = vsel %vm648_vm1, %v655_v24, %v659_v25  ;;  %v1357_v42 = vshrl.u32 %v3936_v36, 16  ;;  %v1360_v43 = vshll.u32 %v3936_v36, 16  ;;  %v3955_v52 = vld [vmem:[#allocation2 + $0x18] sm:$0xff]  }
  0xa0   : > { %3066 = vmatmul.mubr.bf16.vlgmr.msra.gmra.mrb[0].mxu1 %v660_v34  ;;  %v1354_v38 = vor.u32 %v1353_v32, %v1350_v31  ;;  %v668_v62 = vsel %vm648_vm1, %v663_v54, %v667_v48  ;;  %v673_v0 = vshll.u32 %v3955_v52, 16  ;;  %v669_v63 = vshrl.u32 %v3923_v18, 16  ;;  %v3583_v31 = vld [vmem:[%s4474_s3 + $0x160] sm:$0xff]   ;;  %v3589_v54 = vld [vmem:[%s4474_s3 + $0x30] sm:$0xff]  }
  0xa1   : > { %v2827_v41 = vpack.c.bf16 %v504_v33, %v504_v33  ;;  %3069 = vmatprep.mubr.msk.bf16.mxu1 %vm3655_vm0, %v3654_v5  ;;  %3086 = vmatpush3.bf16.msra.mxu1 %v3572_v26  ;;  %v1359_v50 = vrot.slane %v1357_v42, 1  ;;  %v1362_v51 = vrot.slane %v1360_v43, 2  ;;  %v967_v16 = vrot.slane %v2634_v2, 1 }
  0xa2   : > { %v3948_v44 = vpop.permute.xlu1 %2352  ;;  %v1355_v45 = vsel %vm1338_vm2, %v1346_v37, %v1354_v38  ;;  %3087 = vmatprep.subr.bf16.mxu1 %v3654_v5  ;;  %v3953_v47 = vld [vmem:[#allocation2 + $0x1c] sm:$0xff]   ;;  %v675_v11 = vrot.slane %v673_v0, 1  ;;  %v968_v17 = vrot.slane %v3911_v3, 1  ;;  %v671_v19 = vor.u32 %v669_v63, %v667_v48 }
  0xa3   : > { %574 = vst [vmem:[#allocation2 + $0x30] sm:$0xf] %v2827_v41  ;;  %3210 = vmatmul.mubr.bf16.vlgmr.msra.gmra.mrb[0].mxu0 %v1355_v45  ;;  %v1366_v55 = vshrl.u32 %v3953_v47, 16  ;;  %v1363_v59 = vor.u32 %v1362_v51, %v1359_v50  ;;  %v1369_v61 = vshll.u32 %v3953_v47, 16  ;;  %v3990_v14 = vld [vmem:[#allocation2 + $0x20] sm:$0xff]   ;;  %v970_v29 = vrot.slane %v3923_v18, 1 }
  0xa4   : > { %3230 = vmatpush3.bf16.msra.mxu0 %v3570_v39  ;;  %3213 = vmatprep.mubr.msk.bf16.mxu0 %vm3655_vm0, %v3654_v5  ;;  %v4007_v25 = vsel %vm966_vm3, %v967_v16, %v968_v17  ;;  %v676_v26 = vsel %vm648_vm1, %v671_v19, %v675_v11  ;;  %v681_v28 = vshll.u32 %v3990_v14, 16  ;;  %v972_v30 = vrot.slane %v3955_v52, 1  ;;  %v3587_v45 = vld [vmem:[%s4474_s3 + $0x168] sm:$0xff]   ;;  %v3593_v16 = vld [vmem:[%s4474_s3 + $0x178] sm:$0xff]  }
  0xa5   : > { %3231 = vmatprep.subr.bf16.mxu0 %v3654_v5  ;;  %3088 = vmatpush3.bf16.msra.mxu1 %v3575_v40  ;;  %v1368_v4 = vrot.slane %v1366_v55, 1  ;;  %v1364_v57 = vsel %vm1338_vm2, %v1354_v38, %v1363_v59  ;;  %v1371_v9 = vrot.slane %v1369_v61, 2  ;;  %v4021_v32 = vsel %vm966_vm3, %v968_v17, %v970_v29  ;;  %v3586_v38 = vld [vmem:[%s4474_s3 + $0x28] sm:$0xff]   ;;  %v4081_v17 = vld [vmem:[#allocation2 + $0x10] sm:$0xff]  }
  0xa6   : > { %v3964_v58 = vpop.permute.xlu1 %2362  ;;  %3089 = vmatprep.subr.bf16.mxu1 %v3654_v5  ;;  %v3986_v10 = vld [vmem:[#allocation2 + $0x24] sm:$0xff]   ;;  %v4027_v39 = vld [vmem:[#allocation2 + $0x2c] ss:$0 sps:$4 sm:$0x33]   ;;  %v4032_v40 = vsel %vm966_vm3, %v970_v29, %v972_v30  ;;  %v677_v41 = vshrl.u32 %v3955_v52, 16  ;;  %v683_v42 = vrot.slane %v681_v28, 1 }
  0xa7   : > { %v1372_v21 = vor.u32 %v1371_v9, %v1368_v4  ;;  %v1375_v23 = vshrl.u32 %v3986_v10, 16  ;;  %v1378_v24 = vshll.u32 %v3986_v10, 16  ;;  %v4036_v43 = vld [vmem:[#allocation2 + $0x28] ss:$0 sps:$4 sm:$0x11]   ;;  %v1170_v46 = vrot.slane %v3918_v12, 1 }
  0xa8   : > { %3070 = vmatmul.mubr.bf16.gmra.mrb[4].mxu1 %v668_v62  ;;  %3232 = vmatpush3.bf16.msra.mxu0 %v3573_v53  ;;  %v1171_v48 = vrot.slane %v3920_v13, 1  ;;  %v679_v50 = vor.u32 %v677_v41, %v675_v11  ;;  %v1173_v51 = vrot.slane %v3936_v36, 1  ;;  %v1384_v55 = vshrl.u32 %v4027_v39, 16  ;;  %v3590_v62 = vld [vmem:[%s4474_s3 + $0x170] sm:$0xff]   ;;  %v3592_v9 = vld [vmem:[%s4474_s3 + $0x38] sm:$0xff]  }
  0xa9   : > { %3233 = vmatprep.subr.bf16.mxu0 %v3654_v5  ;;  %3073 = vmatprep.mubr.msk.bf16.mxu1 %vm3655_vm0, %v3654_v5  ;;  %v1373_v34 = vsel %vm1338_vm2, %v1363_v59, %v1372_v21  ;;  %v1377_v35 = vrot.slane %v1375_v23, 1  ;;  %v1380_v37 = vrot.slane %v1378_v24, 2  ;;  %v1387_v56 = vshll.u32 %v4027_v39, 16  ;;  %v2111_v24 = vld [vmem:[#allocation2 + $0x8] sm:$0x8] }
  0xaa   : > { %v3983_v8 = vpop.permute.xlu1 %2372  ;;  %3090 = vmatpush3.bf16.msra.mxu1 %v3578_v60  ;;  %v4053_v59 = vsel %vm966_vm3, %v1170_v46, %v1171_v48  ;;  %v684_v12 = vsel %vm648_vm1, %v679_v50, %v683_v42  ;;  %v689_v60 = vshll.u32 %v4036_v43, 16  ;;  %v4059_v61 = vsel %vm966_vm3, %v1171_v48, %v1173_v51  ;;  %v3596_v48 = vld [vmem:[%s4474_s3 + $0x80] sm:$0xff]  }
  0xab   : > { %3214 = vmatmul.mubr.bf16.gmra.mrb[4].mxu0 %v1364_v57  ;;  %3091 = vmatprep.subr.bf16.mxu1 %v3654_v5  ;;  %v1381_v53 = vor.u32 %v1380_v37, %v1377_v35  ;;  %v1175_v0 = vrot.slane %v3953_v47, 1  ;;  %v1177_v2 = vrot.slane %v3986_v10, 1  ;;  %v1389_v57 = vrot.slane %v1387_v56, 2  ;;  %v1528_v37 = vld [vmem:[#allocation2 + $0x4] sm:$0xc]  ;;  %v3599_v56 = vld [vmem:[%s4474_s3 + $0x190] sm:$0xff]  }
  0xac   : > { %3234 = vmatpush3.bf16.msra.mxu0 %v3576_v1  ;;  %3217 = vmatprep.mubr.msk.bf16.mxu0 %vm3655_vm0, %v3654_v5  ;;  %v3640_v1 = vld [vmem:[#allocation2 + $0x2c] ss:$0 sps:$4 sm:$0x11]   ;;  %v685_v11 = vshrl.u32 %v3990_v14, 16  ;;  %v2714_v46 = vcombine.low %v1528_v37, %v3913_v6  ;;  %v1551_v50 = vrot.slane %v3920_v13, 2  ;;  %v1553_v13 = vrot.slane %v3936_v36, 2 }
  0xad   : > { %3235 = vmatprep.subr.bf16.mxu0 %v3654_v5  ;;  %v1382_v4 = vsel %vm1338_vm2, %v1372_v21, %v1381_v53  ;;  %v4074_v63 = vsel %vm966_vm3, %v1173_v51, %v1175_v0  ;;  %v4084_v19 = vsel %vm966_vm3, %v1175_v0, %v1177_v2  ;;  %v4088_v21 = vld [vmem:[#allocation2 + $0xc] sm:$0xf]  ;;  %v1179_v23 = vrot.slane %v3640_v1, 1  ;;  %v3603_v0 = vld [vmem:[%s4474_s3 + $0x1a0] sm:$0xff]   ;;  %v3619_v37 = vld [vmem:[%s4474_s3 + $0x1d0] sm:$0xff]  }
  0xae   : > { %v3999_v20 = vpop.permute.xlu1 %2382  ;;  %3092 = vmatpush3.bf16.msra.mxu1 %v3581_v7  ;;  %v1386_v7 = vrot.slane %v1384_v55, 1  ;;  %v1550_v51 = vrot.slane %v2714_v46, 2  ;;  %v3598_v6 = vld [vmem:[%s4474_s3 + $0x88] sm:$0xff]   ;;  %v3600_v55 = vld [vmem:[%s4474_s3 + $0x90] sm:$0xff]   ;;  %v1554_v36 = vsel %vm1549_vm5, %v1551_v50, %v1553_v13  ;;  %v3623_v46 = vld [vmem:[%s4474_s3 + $0xd8] sm:$0xff]  }
  0xaf   : > { %3093 = vmatprep.subr.bf16.mxu1 %v3654_v5  ;;  %v4094_v29 = vsel %vm966_vm3, %v1177_v2, %v1179_v23  ;;  %v3605_v1 = vld [vmem:[%s4474_s3 + $0xa8] sm:$0xff]   ;;  %v1557_v2 = vrot.slane %v3986_v10, 2  ;;  %v3615_v23 = vld [vmem:[%s4474_s3 + $0xc0] sm:$0xff]  }
  0xb0   : > { %3074 = vmatmul.mubr.bf16.gmra.mrb[8].mxu1 %v676_v26  ;;  %3236 = vmatpush3.bf16.msra.mxu0 %v3579_v15  ;;  %v691_v15 = vrot.slane %v689_v60, 1  ;;  %v687_v26 = vor.u32 %v685_v11, %v683_v42  ;;  %v1390_v28 = vor.u32 %v1389_v57, %v1386_v7  ;;  %v1555_v60 = vrot.slane %v3953_v47, 2  ;;  %v3608_v7 = vld [vmem:[%s4474_s3 + $0x1b0] sm:$0xff]   ;;  %v3609_v57 = vld [vmem:[%s4474_s3 + $0xb8] sm:$0xff]  }
  0xb1   : > { %3077 = vmatprep.mubr.msk.bf16.mxu1 %vm3655_vm0, %v3654_v5  ;;  %3237 = vmatprep.subr.bf16.mxu0 %v3654_v5  ;;  %v1559_v11 = vrot.slane %v4027_v39, 2 }
  0xb2   : > { %v490_v33 = vpop.permute.xlu1 %489  ;;  %3094 = vmatpush3.bf16.msra.mxu1 %v3584_v22  ;;  %v4090_v22 = vld [vmem:[#allocation2 + $0x18] sm:$0xff]   ;;  %v1391_v41 = vsel %vm1338_vm2, %v1381_v53, %v1390_v28  ;;  %v3595_v53 = vld [vmem:[%s4474_s3 + $0x180] sm:$0xff]   ;;  %v1556_v47 = vsel %vm1549_vm5, %v1553_v13, %v1555_v60  ;;  %v1558_v10 = vsel %vm1549_vm5, %v1555_v60, %v1557_v2 }
  0xb3   : > { %3218 = vmatmul.mubr.bf16.gmra.mrb[8].mxu0 %v1373_v34  ;;  %3095 = vmatprep.subr.bf16.mxu1 %v3654_v5  ;;  %v2794_v33 = vcombine.low %v2111_v24, %v4088_v21  ;;  %v2134_v34 = vrot.slane %v4081_v17, 3  ;;  %v2136_v35 = vrot.slane %v4090_v22, 3  ;;  %v1754_v24 = vrot.slane %v4081_v17, 2  ;;  %v3614_v28 = vld [vmem:[%s4474_s3 + $0x1c0] sm:$0xff]  }
  0xb4   : > { %3238 = vmatpush3.bf16.msra.mxu0 %v3583_v31  ;;  %3221 = vmatprep.mubr.msk.bf16.mxu0 %vm3655_vm0, %v3654_v5  ;;  %v692_v31 = vsel %vm648_vm1, %v687_v26, %v691_v15  ;;  %v1697_v15 = vld [vmem:[#allocation2 + $0x8] sm:$0xc] }
  0xb5   : > { %3239 = vmatprep.subr.bf16.mxu0 %v3654_v5  ;;  %v4108_v42 = vsel %vm2132_vm4, %v2134_v34, %v2136_v35  ;;  %v4216_v39 = vcombine.low %v1697_v15, %v4088_v21  ;;  %v3618_v21 = vld [vmem:[%s4474_s3 + $0xc8] sm:$0xff]  }
  0xb6   : > { %3096 = vmatpush3.bf16.msra.mxu1 %v3586_v38  ;;  %v2133_v38 = vrot.slane %v2794_v33, 3  ;;  %v1756_v33 = vrot.slane %v4090_v22, 2 }
  0xb7   : > { %3097 = vmatprep.subr.bf16.mxu1 %v3654_v5  ;;  %v1753_v26 = vrot.slane %v4216_v39, 2 }
  0xb8   : > { %3078 = vmatmul.mubr.bf16.gmra.mrb[12].mxu1 %v684_v12  ;;  %3240 = vmatpush3.bf16.msra.mxu0 %v3587_v45  ;;  %v4111_v45 = vsel %vm2132_vm4, %v2133_v38, %v2134_v34  ;;  %v3602_v12 = vld [vmem:[%s4474_s3 + $0x98] sm:$0xff]   ;;  %v3620_v34 = vld [vmem:[%s4474_s3 + $0xd0] sm:$0xff]   ;;  %v1757_v38 = vsel %vm1549_vm5, %v1754_v24, %v1756_v33 }
  0xb9   : > { %3081 = vmatprep.mubr.msk.bf16.mxu1 %vm3655_vm0, %v3654_v5  ;;  %3241 = vmatprep.subr.bf16.mxu0 %v3654_v5 }
  0xba   : > { %3098 = vmatpush3.bf16.msra.mxu1 %v3589_v54  ;;  %v1552_v54 = vsel %vm1549_vm5, %v1550_v51, %v1551_v50  ;;  %v3625_v50 = vld [vmem:[%s4474_s3 + $0xe0] sm:$0xff]  }
  0xbb   : > { %3222 = vmatmul.mubr.bf16.gmra.mrb[12].mxu0 %v1382_v4  ;;  %3099 = vmatprep.subr.bf16.mxu1 %v3654_v5  ;;  %v3607_v4 = vld [vmem:[%s4474_s3 + $0xb0] sm:$0xff]   ;;  %v3624_v51 = vld [vmem:[%s4474_s3 + $0x1e0] sm:$0xff]  }
  0xbc   : > { %3242 = vmatpush3.bf16.msra.mxu0 %v3590_v62  ;;  %3225 = vmatprep.mubr.msk.bf16.mxu0 %vm3655_vm0, %v3654_v5  ;;  %v3604_v62 = vld [vmem:[%s4474_s3 + $0xa0] sm:$0xff]  }
  0xbd   : > { %3243 = vmatprep.subr.bf16.mxu0 %v3654_v5 }
  0xbe   : > { %3100 = vmatpush3.bf16.msra.mxu1 %v3592_v9  ;;  %v3610_v9 = vld [vmem:[%s4474_s3 + $0x1b8] sm:$0xff]  }
  0xbf   : > { %3121 = vmatprep.subr.bf16.mxu1 %v3654_v5 }
  0xc0   : > { %3082 = vmatmul.mubr.bf16.gmra.mrb[16].mxu1 %v692_v31  ;;  %3244 = vmatpush3.bf16.msra.mxu0 %v3593_v16  ;;  %v1560_v16 = vsel %vm1549_vm5, %v1557_v2, %v1559_v11  ;;  %v1755_v31 = vsel %vm1549_vm5, %v1753_v26, %v1754_v24  ;;  %v1943_v11 = vshll.u32 %v4090_v22, 16  ;;  %v3636_v26 = vld [vmem:[%s4474_s3 + $0x210] sm:$0xff]  }
  0xc1   : > { %3101 = vmatprep.mubr.msk.bf16.mxu1 %vm3655_vm0, %v3654_v5  ;;  %3265 = vmatprep.subr.bf16.mxu0 %v3654_v5 }
  0xc2   : > { %v1945_v24 = vrot.slane %v1943_v11, 3 }
  0xc3   : > { %3226 = vmatmul.mubr.bf16.gmra.mrb[16].mxu0 %v1391_v41  ;;  %v4253_v41 = vld [vmem:[#allocation2 + $0x20] sm:$0xff]  }
  0xc4   : > { %3245 = vmatprep.mubr.msk.bf16.mxu0 %vm3655_vm0, %v3654_v5 }
  0xc8   : > { %3102 = vmatmul.mubr.bf16.vlgmr.msra.gmra.mrb[0].mxu1 %v3909_v49  ;;  %v3597_v49 = vld [vmem:[%s4474_s3 + $0x188] sm:$0xff]  }
  0xc9   : > { %3105 = vmatprep.mubr.msk.bf16.mxu1 %vm3655_vm0, %v3654_v5  ;;  %3122 = vmatpush3.bf16.msra.mxu1 %v3596_v48  ;;  %v1758_v48 = vrot.slane %v4253_v41, 2 }
  0xca   : > { %3123 = vmatprep.subr.bf16.mxu1 %v3654_v5 }
  0xcb   : > { %3246 = vmatmul.mubr.bf16.vlgmr.msra.gmra.mrb[0].mxu0 %v1552_v54  ;;  %v3627_v54 = vld [vmem:[%s4474_s3 + $0xe8] sm:$0xff]  }
  0xcc   : > { %3266 = vmatpush3.bf16.msra.mxu0 %v3595_v53  ;;  %3249 = vmatprep.mubr.msk.bf16.mxu0 %vm3655_vm0, %v3654_v5  ;;  %v1759_v53 = vsel %vm1549_vm5, %v1756_v33, %v1758_v48 }
  0xcd   : > { %3267 = vmatprep.subr.bf16.mxu0 %v3654_v5  ;;  %3124 = vmatpush3.bf16.msra.mxu1 %v3598_v6  ;;  %v4278_v6 = vld [vmem:[#allocation2 + $0x28] sm:$0xff]  }
  0xce   : > { %3125 = vmatprep.subr.bf16.mxu1 %v3654_v5  ;;  %v1760_v13 = vrot.slane %v4278_v6, 2 }
  0xd0   : > { %3106 = vmatmul.mubr.bf16.gmra.mrb[4].mxu1 %v3911_v3  ;;  %3268 = vmatpush3.bf16.msra.mxu0 %v3597_v49  ;;  %v3601_v3 = vld [vmem:[%s4474_s3 + $0x198] sm:$0xff]   ;;  %v3628_v49 = vld [vmem:[%s4474_s3 + $0x1e8] sm:$0xff]  }
  0xd1   : > { %3269 = vmatprep.subr.bf16.mxu0 %v3654_v5  ;;  %3109 = vmatprep.mubr.msk.bf16.mxu1 %vm3655_vm0, %v3654_v5 }
  0xd2   : > { %3126 = vmatpush3.bf16.msra.mxu1 %v3600_v55  ;;  %v3629_v55 = vld [vmem:[%s4474_s3 + $0xf0] sm:$0xff]  }
  0xd3   : > { %3250 = vmatmul.mubr.bf16.gmra.mrb[4].mxu0 %v1554_v36  ;;  %3127 = vmatprep.subr.bf16.mxu1 %v3654_v5  ;;  %v1761_v36 = vsel %vm1549_vm5, %v1758_v48, %v1760_v13 }
  0xd4   : > { %3270 = vmatpush3.bf16.msra.mxu0 %v3599_v56  ;;  %3253 = vmatprep.mubr.msk.bf16.mxu0 %vm3655_vm0, %v3654_v5  ;;  %v3630_v56 = vld [vmem:[%s4474_s3 + $0x1f0] sm:$0xff]  }
  0xd5   : > { %3271 = vmatprep.subr.bf16.mxu0 %v3654_v5 }
  0xd6   : > { %3128 = vmatpush3.bf16.msra.mxu1 %v3602_v12  ;;  %v3631_v12 = vld [vmem:[#allocation2 + $0x30] ss:$0 sps:$4 sm:$0x33]  }
  0xd7   : > { %3129 = vmatprep.subr.bf16.mxu1 %v3654_v5  ;;  %v1762_v60 = vrot.slane %v3631_v12, 2  ;;  %v2140_v12 = vrot.slane %v4278_v6, 3 }
  0xd8   : > { %3110 = vmatmul.mubr.bf16.gmra.mrb[8].mxu1 %v3923_v18  ;;  %3272 = vmatpush3.bf16.msra.mxu0 %v3601_v3  ;;  %v3606_v18 = vld [vmem:[%s4474_s3 + $0x1a8] sm:$0xff]   ;;  %v3633_v3 = vld [vmem:[%s4474_s3 + $0x1f8] sm:$0xff]  }
  0xd9   : > { %3113 = vmatprep.mubr.msk.bf16.mxu1 %vm3655_vm0, %v3654_v5  ;;  %3273 = vmatprep.subr.bf16.mxu0 %v3654_v5 }
  0xda   : > { %3130 = vmatpush3.bf16.msra.mxu1 %v3604_v62  ;;  %v1931_v62 = vshrl.u32 %v4081_v17, 16 }
  0xdb   : > { %3254 = vmatmul.mubr.bf16.gmra.mrb[8].mxu0 %v1556_v47  ;;  %3131 = vmatprep.subr.bf16.mxu1 %v3654_v5  ;;  %v1923_v47 = vshrl.u32 %v4216_v39, 16 }
  0xdc   : > { %3274 = vmatpush3.bf16.msra.mxu0 %v3603_v0  ;;  %3257 = vmatprep.mubr.msk.bf16.mxu0 %vm3655_vm0, %v3654_v5  ;;  %v1934_v0 = vshll.u32 %v4081_v17, 16  ;;  %v1933_v2 = vrot.slane %v1931_v62, 2 }
  0xdd   : > { %3275 = vmatprep.subr.bf16.mxu0 %v3654_v5  ;;  %v1925_v17 = vrot.slane %v1923_v47, 2 }
  0xde   : > { %3132 = vmatpush3.bf16.msra.mxu1 %v3605_v1  ;;  %v1926_v1 = vshll.u32 %v4216_v39, 16 }
  0xdf   : > { %3133 = vmatprep.subr.bf16.mxu1 %v3654_v5 }
  0xe0   : > { %3114 = vmatmul.mubr.bf16.gmra.mrb[12].mxu1 %v3955_v52  ;;  %3276 = vmatpush3.bf16.msra.mxu0 %v3606_v18  ;;  %v3632_v52 = vld [vmem:[%s4474_s3 + $0xf8] sm:$0xff]   ;;  %v1763_v18 = vsel %vm1549_vm5, %v1760_v13, %v1762_v60 }
  0xe1   : > { %3117 = vmatprep.mubr.msk.bf16.mxu1 %vm3655_vm0, %v3654_v5  ;;  %3277 = vmatprep.subr.bf16.mxu0 %v3654_v5 }
  0xe2   : > { %3134 = vmatpush3.bf16.msra.mxu1 %v3607_v4  ;;  %v1936_v4 = vrot.slane %v1934_v0, 3 }
  0xe3   : > { %3258 = vmatmul.mubr.bf16.gmra.mrb[12].mxu0 %v1558_v10  ;;  %3135 = vmatprep.subr.bf16.mxu1 %v3654_v5  ;;  %v3634_v10 = vld [vmem:[%s4474_s3 + $0x200] sm:$0xff]  }
  0xe4   : > { %3278 = vmatpush3.bf16.msra.mxu0 %v3608_v7  ;;  %3261 = vmatprep.mubr.msk.bf16.mxu0 %vm3655_vm0, %v3654_v5  ;;  %v1928_v7 = vrot.slane %v1926_v1, 3 }
  0xe5   : > { %3279 = vmatprep.subr.bf16.mxu0 %v3654_v5 }
  0xe6   : > { %3136 = vmatpush3.bf16.msra.mxu1 %v3609_v57  ;;  %v1937_v57 = vor.u32 %v1936_v4, %v1933_v2  ;;  %v1929_v15 = vor.u32 %v1928_v7, %v1925_v17 }
  0xe7   : > { %3157 = vmatprep.subr.bf16.mxu1 %v3654_v5 }
  0xe8   : > { %3118 = vmatmul.mubr.bf16.gmra.mrb[16].mxu1 %v3990_v14  ;;  %3280 = vmatpush3.bf16.msra.mxu0 %v3610_v9  ;;  %v1940_v9 = vshrl.u32 %v4090_v22, 16  ;;  %v1938_v39 = vsel %vm1921_vm6, %v1929_v15, %v1937_v57 }
  0xe9   : > { %3137 = vmatprep.mubr.msk.bf16.mxu1 %vm3655_vm0, %v3654_v5  ;;  %3301 = vmatprep.subr.bf16.mxu0 %v3654_v5 }
  0xeb   : > { %3262 = vmatmul.mubr.bf16.gmra.mrb[16].mxu0 %v1560_v16  ;;  %v3635_v16 = vld [vmem:[%s4474_s3 + $0x208] sm:$0xff]  }
  0xec   : > { %3281 = vmatprep.mubr.msk.bf16.mxu0 %vm3655_vm0, %v3654_v5 }
  0xf0   : > { %3138 = vmatmul.mubr.bf16.vlgmr.msra.gmra.mrb[0].mxu1 %v4007_v25  ;;  %v3616_v25 = vld [vmem:[%s4474_s3 + $0x1c8] sm:$0xff]  }
  0xf1   : > { %3141 = vmatprep.mubr.msk.bf16.mxu1 %vm3655_vm0, %v3654_v5  ;;  %3158 = vmatpush3.bf16.msra.mxu1 %v3615_v23  ;;  %v1942_v23 = vrot.slane %v1940_v9, 2 }
  0xf2   : > { %3159 = vmatprep.subr.bf16.mxu1 %v3654_v5 }
  0xf3   : > { %3282 = vmatmul.mubr.bf16.vlgmr.msra.gmra.mrb[0].mxu0 %v1755_v31 }
  0xf4   : > { %3302 = vmatpush3.bf16.msra.mxu0 %v3614_v28  ;;  %3285 = vmatprep.mubr.msk.bf16.mxu0 %vm3655_vm0, %v3654_v5  ;;  %v1949_v28 = vshrl.u32 %v4253_v41, 16 }
  0xf5   : > { %3303 = vmatprep.subr.bf16.mxu0 %v3654_v5  ;;  %3160 = vmatpush3.bf16.msra.mxu1 %v3618_v21  ;;  %v1952_v21 = vshll.u32 %v4253_v41, 16 }
  0xf6   : > { %3161 = vmatprep.subr.bf16.mxu1 %v3654_v5  ;;  %v1951_v33 = vrot.slane %v1949_v28, 2 }
  0xf8   : > { %3142 = vmatmul.mubr.bf16.gmra.mrb[4].mxu1 %v4021_v32  ;;  %3304 = vmatpush3.bf16.msra.mxu0 %v3616_v25  ;;  %v3621_v32 = vld [vmem:[%s4474_s3 + $0x1d8] sm:$0xff]  }
  0xf9   : > { %3305 = vmatprep.subr.bf16.mxu0 %v3654_v5  ;;  %3145 = vmatprep.mubr.msk.bf16.mxu1 %vm3655_vm0, %v3654_v5  ;;  %v3637_v25 = vld [vmem:[%s4474_s3 + $0x218] sm:$0xff]  }
  0xfa   : > { %3162 = vmatpush3.bf16.msra.mxu1 %v3620_v34  ;;  %v1954_v34 = vrot.slane %v1952_v21, 3 }
  0xfb   : > { %3286 = vmatmul.mubr.bf16.gmra.mrb[4].mxu0 %v1757_v38  ;;  %3163 = vmatprep.subr.bf16.mxu1 %v3654_v5  ;;  %v1958_v38 = vshrl.u32 %v4278_v6, 16 }
  0xfc   : > { %3306 = vmatpush3.bf16.msra.mxu0 %v3619_v37  ;;  %3289 = vmatprep.mubr.msk.bf16.mxu0 %vm3655_vm0, %v3654_v5  ;;  %v3638_v37 = vld [vmem:[%s4474_s3 + $0x220] sm:$0xff]  }
  0xfd   : > { %3307 = vmatprep.subr.bf16.mxu0 %v3654_v5  ;;  %v1960_v48 = vrot.slane %v1958_v38, 2 }
  0xfe   : > { %3164 = vmatpush3.bf16.msra.mxu1 %v3623_v46  ;;  %v1961_v46 = vshll.u32 %v4278_v6, 16 }
  0xff   : > { %3165 = vmatprep.subr.bf16.mxu1 %v3654_v5 }
 0x100   : > { %3146 = vmatmul.mubr.bf16.gmra.mrb[8].mxu1 %v4032_v40  ;;  %3308 = vmatpush3.bf16.msra.mxu0 %v3621_v32  ;;  %v974_v40 = vrot.slane %v3990_v14, 1 }
 0x101   : > { %3149 = vmatprep.mubr.msk.bf16.mxu1 %vm3655_vm0, %v3654_v5  ;;  %3309 = vmatprep.subr.bf16.mxu0 %v3654_v5 }
 0x102   : > { %3166 = vmatpush3.bf16.msra.mxu1 %v3625_v50  ;;  %v975_v14 = vsel %vm966_vm3, %v972_v30, %v974_v40  ;;  %v976_v30 = vrot.slane %v4036_v43, 1  ;;  %v1963_v50 = vrot.slane %v1961_v46, 3 }
 0x103   : > { %3290 = vmatmul.mubr.bf16.gmra.mrb[8].mxu0 %v1759_v53  ;;  %3167 = vmatprep.subr.bf16.mxu1 %v3654_v5  ;;  %v3642_v53 = vld [vmem:[#allocation2 + $0x30] ss:$0 sps:$4 sm:$0x77]  }
 0x104   : > { %3310 = vmatpush3.bf16.msra.mxu0 %v3624_v51  ;;  %3293 = vmatprep.mubr.msk.bf16.mxu0 %vm3655_vm0, %v3654_v5  ;;  %v977_v43 = vsel %vm966_vm3, %v974_v40, %v976_v30  ;;  %v3639_v51 = vld [vmem:[%s4474_s3 + $0x228] sm:$0xff]   ;;  %v1967_v40 = vshrl.u32 %v3642_v53, 16 }
 0x105   : > { %3311 = vmatprep.subr.bf16.mxu0 %v3654_v5 }
 0x106   : > { %3168 = vmatpush3.bf16.msra.mxu1 %v3627_v54  ;;  %v3641_v54 = vld [vmem:[%s4474_s3 + $0x230] sm:$0xff]  }
 0x107   : > { %3169 = vmatprep.subr.bf16.mxu1 %v3654_v5 }
 0x108   : > { %3150 = vmatmul.mubr.bf16.gmra.mrb[12].mxu1 %v975_v14  ;;  %3312 = vmatpush3.bf16.msra.mxu0 %v3628_v49  ;;  %v1970_v49 = vshll.u32 %v3642_v53, 16 }
 0x109   : > { %3153 = vmatprep.mubr.msk.bf16.mxu1 %vm3655_vm0, %v3654_v5  ;;  %3313 = vmatprep.subr.bf16.mxu0 %v3654_v5 }
 0x10a   : > { %3170 = vmatpush3.bf16.msra.mxu1 %v3629_v55  ;;  %v1969_v55 = vrot.slane %v1967_v40, 2  ;;  %v1972_v14 = vrot.slane %v1970_v49, 3  ;;  %v2348_v49 = vpop.permute.xlu0 %2347 }
 0x10b   : > { %3294 = vmatmul.mubr.bf16.gmra.mrb[12].mxu0 %v1761_v36  ;;  %3171 = vmatprep.subr.bf16.mxu1 %v3654_v5 }
 0x10c   : > { %3314 = vmatpush3.bf16.msra.mxu0 %v3630_v56  ;;  %3297 = vmatprep.mubr.msk.bf16.mxu0 %vm3655_vm0, %v3654_v5  ;;  %v3643_v56 = vld [vmem:[%s4474_s3 + $0x238] sm:$0xff]  }
 0x10d   : > { %3315 = vmatprep.subr.bf16.mxu0 %v3654_v5 }
 0x10e   : > { %3172 = vmatpush3.bf16.msra.mxu1 %v3632_v52  ;;  %v2138_v52 = vrot.slane %v4253_v41, 3 }
 0x10f   : > { %3373 = vmatprep.subr.bf16.mxu1 %v3654_v5 }
 0x110   : > { %3154 = vmatmul.mubr.bf16.gmra.mrb[16].mxu1 %v977_v43  ;;  %3316 = vmatpush3.bf16.msra.mxu0 %v3633_v3  ;;  %v2141_v30 = vsel %vm2132_vm4, %v2138_v52, %v2140_v12  ;;  %v2139_v41 = vsel %vm2132_vm4, %v2136_v35, %v2138_v52 }
 0x111   : > { %3173 = vmatprep.mubr.msk.bf16.mxu1 %vm3655_vm0, %v3654_v5  ;;  %3337 = vmatprep.subr.bf16.mxu0 %v3654_v5 }
 0x113   : > { %3298 = vmatmul.mubr.bf16.gmra.mrb[16].mxu0 %v1763_v18 }
 0x114   : > { %3317 = vmatprep.mubr.msk.bf16.mxu0 %vm3655_vm0, %v3654_v5 }
 0x118   : > { %3174 = vmatmul.mubr.bf16.vlgmr.msra.gmra.mrb[0].mxu1 %v4053_v59  ;;  %v1946_v59 = vor.u32 %v1945_v24, %v1942_v23 }
 0x119   : > { %3177 = vmatprep.mubr.msk.bf16.mxu1 %vm3655_vm0, %v3654_v5  ;;  %3381 = vmatpush3.bf16.msra.mxu1 %v3634_v10 }
 0x11a   : > { %3374 = vmatprep.subr.bf16.mxu1 %v3654_v5  ;;  %v1947_v31 = vsel %vm1921_vm6, %v1937_v57, %v1946_v59 }
 0x11b   : > { %3318 = vmatmul.mubr.bf16.vlgmr.msra.gmra.mrb[0].mxu0 %v1938_v39 }
 0x11c   : > { %3338 = vmatpush3.bf16.msra.mxu0 %v3634_v10  ;;  %3321 = vmatprep.mubr.msk.bf16.mxu0 %vm3655_vm0, %v3654_v5 }
 0x11d   : > { %3339 = vmatprep.subr.bf16.mxu0 %v3654_v5  ;;  %3382 = vmatpush3.bf16.msra.mxu1 %v3635_v16 }
 0x11e   : > { %3375 = vmatprep.subr.bf16.mxu1 %v3654_v5 }
 0x120   : > { %3178 = vmatmul.mubr.bf16.gmra.mrb[4].mxu1 %v4059_v61  ;;  %3340 = vmatpush3.bf16.msra.mxu0 %v3635_v16  ;;  %v1955_v61 = vor.u32 %v1954_v34, %v1951_v33 }
 0x121   : > { %3341 = vmatprep.subr.bf16.mxu0 %v3654_v5  ;;  %3181 = vmatprep.mubr.msk.bf16.mxu1 %vm3655_vm0, %v3654_v5 }
 0x122   : > { %3383 = vmatpush3.bf16.msra.mxu1 %v3636_v26  ;;  %v1956_v32 = vsel %vm1921_vm6, %v1946_v59, %v1955_v61 }
 0x123   : > { %3322 = vmatmul.mubr.bf16.gmra.mrb[4].mxu0 %v1947_v31  ;;  %3376 = vmatprep.subr.bf16.mxu1 %v3654_v5 }
 0x124   : > { %3342 = vmatpush3.bf16.msra.mxu0 %v3636_v26  ;;  %3325 = vmatprep.mubr.msk.bf16.mxu0 %vm3655_vm0, %v3654_v5 }
 0x125   : > { %3343 = vmatprep.subr.bf16.mxu0 %v3654_v5 }
 0x126   : > { %3384 = vmatpush3.bf16.msra.mxu1 %v3637_v25 }
 0x127   : > { %3377 = vmatprep.subr.bf16.mxu1 %v3654_v5 }
 0x128   : > { %3182 = vmatmul.mubr.bf16.gmra.mrb[8].mxu1 %v4074_v63  ;;  %3344 = vmatpush3.bf16.msra.mxu0 %v3637_v25  ;;  %v1964_v63 = vor.u32 %v1963_v50, %v1960_v48 }
 0x129   : > { %3185 = vmatprep.mubr.msk.bf16.mxu1 %vm3655_vm0, %v3654_v5  ;;  %3345 = vmatprep.subr.bf16.mxu0 %v3654_v5 }
 0x12a   : > { %3385 = vmatpush3.bf16.msra.mxu1 %v3638_v37  ;;  %v1965_v13 = vsel %vm1921_vm6, %v1955_v61, %v1964_v63 }
 0x12b   : > { %3326 = vmatmul.mubr.bf16.gmra.mrb[8].mxu0 %v1956_v32  ;;  %3378 = vmatprep.subr.bf16.mxu1 %v3654_v5 }
 0x12c   : > { %3346 = vmatpush3.bf16.msra.mxu0 %v3638_v37  ;;  %3329 = vmatprep.mubr.msk.bf16.mxu0 %vm3655_vm0, %v3654_v5 }
 0x12d   : > { %3347 = vmatprep.subr.bf16.mxu0 %v3654_v5 }
 0x12e   : > { %3386 = vmatpush3.bf16.msra.mxu1 %v3639_v51 }
 0x12f   : > { %3379 = vmatprep.subr.bf16.mxu1 %v3654_v5 }
 0x130   : > { %3186 = vmatmul.mubr.bf16.gmra.mrb[12].mxu1 %v4084_v19  ;;  %3348 = vmatpush3.bf16.msra.mxu0 %v3639_v51  ;;  %v1973_v19 = vor.u32 %v1972_v14, %v1969_v55 }
 0x131   : > { %3189 = vmatprep.mubr.msk.bf16.mxu1 %vm3655_vm0, %v3654_v5  ;;  %3349 = vmatprep.subr.bf16.mxu0 %v3654_v5 }
 0x132   : > { %3387 = vmatpush3.bf16.msra.mxu1 %v3641_v54  ;;  %v1974_v36 = vsel %vm1921_vm6, %v1964_v63, %v1973_v19 }
 0x133   : > { %3330 = vmatmul.mubr.bf16.gmra.mrb[12].mxu0 %v1965_v13  ;;  %3380 = vmatprep.subr.bf16.mxu1 %v3654_v5 }
 0x134   : > { %3350 = vmatpush3.bf16.msra.mxu0 %v3641_v54  ;;  %3333 = vmatprep.mubr.msk.bf16.mxu0 %vm3655_vm0, %v3654_v5 }
 0x135   : > { %3351 = vmatprep.subr.bf16.mxu0 %v3654_v5 }
 0x136   : > { %3388 = vmatpush3.bf16.msra.mxu1 %v3643_v56 }
 0x138   : > { %3190 = vmatmul.mubr.bf16.gmra.mrb[16].mxu1 %v4094_v29  ;;  %3352 = vmatpush3.bf16.msra.mxu0 %v3643_v56  ;;  %v2142_v29 = vrot.slane %v3642_v53, 3 }
 0x139   : > { %3365 = vmatprep.mubr.msk.bf16.mxu1 %vm3655_vm0, %v3654_v5 }
 0x13a   : > { %v2143_v3 = vsel %vm2132_vm4, %v2140_v12, %v2142_v29 }
 0x13b   : > { %3334 = vmatmul.mubr.bf16.gmra.mrb[16].mxu0 %v1974_v36 }
 0x13c   : > { %3353 = vmatprep.mubr.msk.bf16.mxu0 %vm3655_vm0, %v3654_v5 }
 0x140   : > { %3366 = vmatmul.mubr.bf16.vlgmr.msra.gmra.mrb[20].mxu1 %v2141_v30 }
 0x141   : > { %3369 = vmatprep.mubr.msk.bf16.mxu1 %vm3655_vm0, %v3654_v5 }
 0x143   : > { %3354 = vmatmul.mubr.bf16.vlgmr.msra.gmra.mrb[0].mxu0 %v4111_v45 }
 0x144   : > { %3357 = vmatprep.mubr.msk.bf16.mxu0 %vm3655_vm0, %v3654_v5 }
 0x148   : > { %3370 = vmatmul.mubr.bf16.gmra.mrb[24].mxu1 %v2143_v3 }
 0x14b   : > { %3358 = vmatmul.mubr.bf16.gmra.mrb[4].mxu0 %v4108_v42 }
 0x14c   : > { %3361 = vmatprep.mubr.msk.bf16.mxu0 %vm3655_vm0, %v3654_v5 }
 0x153   : > { %3362 = vmatmul.mubr.bf16.gmra.mrb[8].mxu0 %v2139_v41 }
 0x1eb   : > { %v1268_v6 = vpop.f32.mrb[0].mxu1 }
 0x1ec   : > { %v3175_v60 = vpop.f32.mrb[1].mxu1 }
 0x1ed   : > { %v1271_v45 = vpop.f32.mrb[2].mxu1 }
 0x1ee   : > { %v3176_v62 = vpop.f32.mrb[3].mxu1 }
 0x1f3   : > { %v1276_v0 = vpop.f32.mrb[4].mxu1 }
 0x1f4   : > { %v3179_v43 = vpop.f32.mrb[5].mxu1 }
 0x1f5   : > { %v4418_v47 = vpop.f32.mrb[6].mxu1 }
 0x1f6   : > { %v3180_v1 = vpop.f32.mrb[7].mxu1 }
 0x1f7   : > { %v2358_v1 = vpop.permute.xlu0 %2357 }
 0x1fb   : > { %v4420_v18 = vpop.f32.mrb[8].mxu1 }
 0x1fc   : > { %v3183_v42 = vpop.f32.mrb[9].mxu1 }
 0x1fd   : > { %v4422_v2 = vpop.f32.mrb[10].mxu1 }
 0x1fe   : > { %v3184_v5 = vpop.f32.mrb[11].mxu1 }
 0x203   : > { %v1292_v4 = vpop.f32.mrb[12].mxu1 }
 0x204   : > { %v3187_v22 = vpop.f32.mrb[13].mxu1 }
 0x205   : > { %v1295_v17 = vpop.f32.mrb[14].mxu1 }
 0x206   : > { %v3188_v35 = vpop.f32.mrb[15].mxu1  ;;  %v2086_v7 = vpop.f32.mrb[12].mxu0 }
 0x207   : > { %v3395_v10 = vadd.f32 %v2086_v7, %v1292_v4  ;;  %v3331_v57 = vpop.f32.mrb[13].mxu0 }
 0x208   : > { %v2089_v9 = vpop.f32.mrb[14].mxu0 }
 0x209   : > { %v3397_v11 = vadd.f32 %v2089_v9, %v1295_v17  ;;  %v3332_v15 = vpop.f32.mrb[15].mxu0 }
 0x20a   : > { %v2368_v15 = vpop.permute.xlu0 %2367 }
 0x20b   : > { %v1300_v16 = vpop.f32.mrb[16].mxu1 }
 0x20c   : > { %v3191_v39 = vpop.f32.mrb[17].mxu1 }
 0x20d   : > { %v1303_v23 = vpop.f32.mrb[18].mxu1 }
 0x20e   : > { %v3192_v24 = vpop.f32.mrb[19].mxu1  ;;  %v2094_v59 = vpop.f32.mrb[16].mxu0 }
 0x20f   : > { %v3399_v26 = vadd.f32 %v2094_v59, %v1300_v16  ;;  %v3335_v28 = vpop.f32.mrb[17].mxu0 }
 0x210   : > { %v2097_v21 = vpop.f32.mrb[18].mxu0 }
 0x211   : > { %v3401_v31 = vadd.f32 %v2097_v21, %v1303_v23  ;;  %v3336_v25 = vpop.f32.mrb[19].mxu0 }
 0x213   : > { %v2255_v33 = vpop.f32.mrb[20].mxu1 }
 0x214   : > { %v4425_v34 = vadd.f32 %v3395_v10, %v2255_v33  ;;  %v3367_v61 = vpop.f32.mrb[21].mxu1 }
 0x215   : > { %v2258_v37 = vpop.f32.mrb[22].mxu1 }
 0x216   : > { %v4427_v38 = vadd.f32 %v3397_v11, %v2258_v37  ;;  %v3368_v46 = vpop.f32.mrb[23].mxu1  ;;  %v2231_v32 = vpop.f32.mrb[0].mxu0 }
 0x217   : > { %v3389_v48 = vadd.f32 %v2231_v32, %v1268_v6  ;;  %v3355_v50 = vpop.f32.mrb[1].mxu0  ;;  %v2378_v37 = vpop.permute.xlu0 %2377  ;;  %v2422_v46 = vmul.f32 %v4425_v34, %v4425_v34  ;;  %v2396_v32 = vmul.f32 %v4425_v34, %v3983_v8 }
 0x218   : > { %v2911_v51 = vpack.c.bf16 %v4427_v38, %v4425_v34  ;;  %v2234_v53 = vpop.f32.mrb[2].mxu0 }
 0x219   : > { %v2416_v63 = vmul.f32 %v3389_v48, %v3389_v48  ;;  %v3390_v54 = vadd.f32 %v2234_v53, %v1271_v45  ;;  %v3356_v40 = vpop.f32.mrb[3].mxu0  ;;  %v2390_v13 = vmul.f32 %v3389_v48, %v3932_v27  ;;  %v2397_v53 = vmul.f32 %v4427_v38, %v2378_v37 }
 0x21a   : > { %2930 = vst [vmem:[%s4432_s10 + $0x18] sm:$0xff] %v2911_v51  }
 0x21b   : > { %v2896_v55 = vpack.c.bf16 %v3390_v54, %v3389_v48  ;;  %v2391_v14 = vmul.f32 %v3390_v54, %v2348_v49  ;;  %v2417_v56 = vmul.f32 %v3390_v54, %v3390_v54  ;;  %v2263_v19 = vpop.f32.mrb[24].mxu1  ;;  %v2426_v52 = vmul.f32 %v2416_v63, %v3932_v27 }
 0x21c   : > { %v3400_v36 = vadd.f32 %v3399_v26, %v2263_v19  ;;  %v3371_v12 = vpop.f32.mrb[25].mxu1  ;;  %v2432_v63 = vmul.f32 %v2422_v46, %v3983_v8 }
 0x21d   : > { %2897 = vst [vmem:[%s4432_s10] sm:$0xff] %v2896_v55   ;;  %v2400_v30 = vadd.f32 %v2391_v14, %v2390_v13  ;;  %v2427_v29 = vmul.f32 %v2417_v56, %v2348_v49  ;;  %v2266_v3 = vpop.f32.mrb[26].mxu1  ;;  %v2388_v55 = vpop.permute.xlu0 %2387 }
 0x21e   : > { %v3402_v41 = vadd.f32 %v3401_v31, %v2266_v3  ;;  %v3372_v6 = vpop.f32.mrb[27].mxu1  ;;  %v2239_v60 = vpop.f32.mrb[4].mxu0  ;;  %v2424_v54 = vmul.f32 %v3400_v36, %v3400_v36  ;;  %v2398_v49 = vmul.f32 %v3400_v36, %v3999_v20 }
 0x21f   : > { %v2436_v45 = vadd.f32 %v2427_v29, %v2426_v52  ;;  %v3391_v62 = vadd.f32 %v2239_v60, %v1276_v0  ;;  %v3359_v43 = vpop.f32.mrb[5].mxu0 }
 0x220   : > { %v2916_v42 = vpack.c.bf16 %v3402_v41, %v3400_v36  ;;  %v2242_v5 = vpop.f32.mrb[6].mxu0  ;;  %v2425_v34 = vmul.f32 %v3402_v41, %v3402_v41  ;;  %v2399_v19 = vmul.f32 %v3402_v41, %v2388_v55  ;;  %v2434_v52 = vmul.f32 %v2424_v54, %v3999_v20 }
 0x221   : > { %v2392_v4 = vmul.f32 %v3391_v62, %v3948_v44  ;;  %v2418_v22 = vmul.f32 %v3391_v62, %v3391_v62  ;;  %v3392_v27 = vadd.f32 %v2242_v5, %v4418_v47  ;;  %v3360_v17 = vpop.f32.mrb[7].mxu0 }
 0x222   : > { %2931 = vst [vmem:[%s4432_s10 + $0x20] sm:$0xff] %v2916_v42  }
 0x223   : > { %v2401_v35 = vadd.f32 %v2400_v30, %v2392_v4  ;;  %v2428_v7 = vmul.f32 %v2418_v22, %v3948_v44  ;;  %v2901_v10 = vpack.c.bf16 %v3392_v27, %v3391_v62  ;;  %v2393_v57 = vmul.f32 %v3392_v27, %v2358_v1 }
 0x224   : > { %v2419_v9 = vmul.f32 %v3392_v27, %v3392_v27 }
 0x225   : > { %v2437_v11 = vadd.f32 %v2436_v45, %v2428_v7  ;;  %2928 = vst [vmem:[%s4432_s10 + $0x8] sm:$0xff] %v2901_v10   ;;  %v2402_v0 = vadd.f32 %v2401_v35, %v2393_v57 }
 0x226   : > { %v2429_v16 = vmul.f32 %v2419_v9, %v2358_v1  ;;  %v2247_v39 = vpop.f32.mrb[8].mxu0 }
 0x227   : > { %v3393_v23 = vadd.f32 %v2247_v39, %v4420_v18  ;;  %v3363_v24 = vpop.f32.mrb[9].mxu0 }
 0x228   : > { %v2438_v59 = vadd.f32 %v2437_v11, %v2429_v16  ;;  %v2250_v47 = vpop.f32.mrb[10].mxu0 }
 0x229   : > { %v2394_v26 = vmul.f32 %v3393_v23, %v3964_v58  ;;  %v2420_v28 = vmul.f32 %v3393_v23, %v3393_v23  ;;  %v3394_v44 = vadd.f32 %v2250_v47, %v4422_v2  ;;  %v3364_v21 = vpop.f32.mrb[11].mxu0  ;;  %v2423_v2 = vmul.f32 %v4427_v38, %v4427_v38 }
 0x22a   : > { %v2435_v38 = vmul.f32 %v2425_v34, %v2388_v55 }
 0x22b   : > { %v2403_v31 = vadd.f32 %v2402_v0, %v2394_v26  ;;  %v2430_v25 = vmul.f32 %v2420_v28, %v3964_v58  ;;  %v2906_v33 = vpack.c.bf16 %v3394_v44, %v3393_v23  ;;  %v2395_v61 = vmul.f32 %v3394_v44, %v2368_v15 }
 0x22c   : > { %v2421_v18 = vmul.f32 %v3394_v44, %v3394_v44  ;;  %v2433_v14 = vmul.f32 %v2423_v2, %v2378_v37 }
 0x22d   : > { %v2439_v48 = vadd.f32 %v2438_v59, %v2430_v25  ;;  %2929 = vst [vmem:[%s4432_s10 + $0x10] sm:$0xff] %v2906_v33   ;;  %v2404_v50 = vadd.f32 %v2403_v31, %v2395_v61 }
 0x22e   : > { %v2431_v51 = vmul.f32 %v2421_v18, %v2368_v15 }
 0x22f   : > { %v2405_v58 = vadd.f32 %v2404_v50, %v2396_v32 }
 0x230   : > { %v2440_v40 = vadd.f32 %v2439_v48, %v2431_v51 }
 0x231   : > { %v2406_v13 = vadd.f32 %v2405_v58, %v2397_v53 }
 0x232   : > { %v2441_v56 = vadd.f32 %v2440_v40, %v2432_v63 }
 0x233   : > { %v2407_v12 = vadd.f32 %v2406_v13, %v2398_v49 }
 0x234   : > { %v2442_v30 = vadd.f32 %v2441_v56, %v2433_v14 }
 0x235   : > { %v2408_v29 = vadd.f32 %v2407_v12, %v2399_v19 }
 0x236   : > { %v2443_v3 = vadd.f32 %v2442_v30, %v2434_v52 }
 0x237   : > { %v2409_v8 = vrot.slane %v2408_v29, 4 }
 0x238   : > { %v2444_v6 = vadd.f32 %v2443_v3, %v2435_v38 }
 0x239   : > { %v2410_v60 = vadd.f32 %v2409_v8, %v2408_v29 }
 0x23a   : > { %v2445_v45 = vrot.slane %v2444_v6, 4 }
 0x23b   : > { %v2411_v36 = vrot.slane %v2410_v60, 2 }
 0x23c   : > { %v2446_v62 = vadd.f32 %v2445_v45, %v2444_v6 }
 0x23d   : > { %v2412_v43 = vadd.f32 %v2411_v36, %v2410_v60 }
 0x23e   : > { %v2447_v1 = vrot.slane %v2446_v62, 2 }
 0x23f   : > { %v2413_v42 = vrot.slane %v2412_v43, 1 }
 0x240   : > { %v2448_v41 = vadd.f32 %v2447_v1, %v2446_v62 }
 0x241   : > { %v2414_v20 = vadd.f32 %v2413_v42, %v2412_v43 }
 0x242   : > { %v2449_v5 = vrot.slane %v2448_v41, 1 }
 0x243   : > { %2415 = vst [vmem:[%s319_s13] sm:$0x1] %v2414_v20 }
 0x244   : > { %v2450_v4 = vadd.f32 %v2449_v5, %v2448_v41 }
 0x246   : > { %2451 = vst [vmem:[%s322_s16] sm:$0x1] %v2450_v4 }
 0x247 PF: > { %s19_s27 = sadd.s32 1, %s3651_s27  }
 0x248   : > { %p16_p4 = scmp.ge.s32.totalorder %s19_s27, 4  }
 0x24a   :  { %18 = sbr.rel (!%p16_p4) target bundleno = 1 (0x1), region = 106 }

</bundles_post_ra>
